<compile_context>
chip_gen: v5e
topology: v5e:2x2
jax: 0.10.0
libtpu: 0.0.40
codegen_flags: <defaults>
</compile_context>

<pallas_src>
import jax
import jax.numpy as jnp
from jax.experimental import pallas as pl
from jax.experimental.pallas import tpu as pltpu

LN_EPS = 1e-5
LOGIT_PAD = 128  # each logit head padded to a full 128-lane block

# Row indices inside the packed (VEC_ROWS, 128) bias/LN/alpha slab.
ROW_B_IH_GRU, ROW_B_HH_GRU = 0, 1
ROW_B_IH_ATT, ROW_B_HH_ATT = 2, 3
ROW_B_IH_SMAN, ROW_B_HH_SMAN = 4, 5
ROW_LN_GRU, ROW_LN_ATT, ROW_LN_SMAN = 6, 7, 8
ROW_BH_LANG, ROW_BH_CTX = 9, 10
ROW_WA_MOTION, ROW_WA_VISUAL = 11, 12
ROW_WA_CM, ROW_WA_CV, ROW_WA_CT = 13, 14, 15
ROW_B_2ATT = 16
VEC_ROWS = 17

VMEM_SPEC = pl.BlockSpec(memory_space=pltpu.MemorySpace.VMEM)
SMEM_SPEC = pl.BlockSpec(memory_space=pltpu.MemorySpace.SMEM)


# --------------------------- fused kernel ---------------------------------- #

def _core_kernel(it_ref, embed_ref,
                 mean_fc_ref, mean_att_ref, state_ref, att_prev_ref,
                 sman_prev_ref, fc_ref, p_fc_ref, attf_ref, p_attf_ref,
                 motion_ref, visual_ref, text_ref,
                 w_gru_ref, wh_lang_ref, wh_ctx_ref, w2att_ref, w_logit_ref,
                 vec_ref, out_ref):
    B, R = state_ref.shape
    A = p_fc_ref.shape[-1]
    E = embed_ref.shape[-1]
    T = motion_ref.shape[1]
    G = 3 * R

    def mm(a, b):
        return jnp.dot(a, b, preferred_element_type=jnp.float32)

    def vrow(row, lo, hi):
        # static (1, hi-lo) slice of the packed bias/LN/alpha slab
        return vec_ref[row:row + 1, lo:hi]

    # GRU slab row offsets: [gru_ih | att_ih | sman_ih | gru_hh | att_hh | sman_hh]
    o1 = E + 3 * R           # end language-GRU W_ih
    o2 = o1 + 3 * R          # end attention-GRU W_ih
    o3 = o2 + 4 * R          # end SMAN-GRU W_ih
    o4 = o3 + R              # end language-GRU W_hh
    o5 = o4 + R              # end attention-GRU W_hh
    o6 = o5 + R              # end SMAN-GRU W_hh

    def gru_cell(x, h, ih, hh, b_ih_row, b_hh_row):
        # PyTorch nn.GRUCell semantics; fused [r|z|n] gate matmuls.
        gi = mm(x, w_gru_ref[ih[0]:ih[1], :]) + vrow(b_ih_row, 0, G)
        gh = mm(h, w_gru_ref[hh[0]:hh[1], :]) + vrow(b_hh_row, 0, G)
        r = jax.nn.sigmoid(gi[:, 0:R] + gh[:, 0:R])
        z = jax.nn.sigmoid(gi[:, R:2 * R] + gh[:, R:2 * R])
        n = jnp.tanh(gi[:, 2 * R:G] + r * gh[:, 2 * R:G])
        return (1.0 - z) * n + z * h

    def layer_norm(x, row):
        g = vrow(row, 0, R)
        b = vrow(row, R, 2 * R)
        mu = jnp.mean(x, axis=-1, keepdims=True)
        var = jnp.mean((x - mu) ** 2, axis=-1, keepdims=True)
        return (x - mu) * jax.lax.rsqrt(var + LN_EPS) * g + b

    def attend(q, feats, p_feats, wa_row):
        # softmax attention over L pre-projected features (masks=None path).
        wa = vrow(wa_row, 0, A)                          # (1, A)
        ba = vrow(wa_row, A, A + 1)                      # (1, 1)
        s = jnp.sum(jnp.tanh(p_feats + q[:, None, :]) * wa, axis=-1) + ba  # (B, L)
        m = jnp.max(s, axis=-1, keepdims=True)
        e = jnp.exp(s - m)
        w = e / jnp.sum(e, axis=-1, keepdims=True)
        return jnp.sum(w[:, :, None] * feats, axis=1)    # (B, R)

    def attend_plus1(q, feats, p_feats, new_feat, p_new, wa_row):
        # attention over [feats ; new_feat] without materializing the concat.
        wa = vrow(wa_row, 0, A)
        ba = vrow(wa_row, A, A + 1)
        s_t = jnp.sum(jnp.tanh(p_feats + q[:, None, :]) * wa, axis=-1) + ba  # (B, T)
        s_n = jnp.sum(jnp.tanh(p_new + q) * wa, axis=-1, keepdims=True) + ba  # (B, 1)
        m = jnp.maximum(jnp.max(s_t, axis=-1, keepdims=True), s_n)
        e_t = jnp.exp(s_t - m)
        e_n = jnp.exp(s_n - m)
        denom = jnp.sum(e_t, axis=-1, keepdims=True) + e_n
        num = jnp.sum(e_t[:, :, None] * feats, axis=1) + e_n * new_feat
        return num / denom                               # (B, R)

    def project(feats3, new_row, w, b):
        # (B, T, R) history + (B, R) appended row -> one 2D MXU matmul.
        flat = jnp.concatenate([feats3[i] for i in range(B)] + [new_row],
                               axis=0)                   # (B*T + B, R)
        out = mm(flat, w) + b                            # (B*T + B, A)
        p_t = jnp.concatenate(
            [jnp.expand_dims(out[i * T:(i + 1) * T], 0) for i in range(B)],
            axis=0)                                      # (B, T, A)
        return p_t, out[B * T:B * T + B]                 # -, (B, A)

    # ---------------- LANGUAGE RNN ----------------
    # embedding gather + ReLU (dropout = identity, eval mode)
    xt_rows = [embed_ref[pl.ds(it_ref[i], 1), :] for i in range(B)]
    xt = jnp.maximum(jnp.concatenate(xt_rows, axis=0), 0.0)            # (B, E)
    gru_x = jnp.concatenate(
        [xt, mean_fc_ref[...], mean_att_ref[...], sman_prev_ref[...]], axis=-1)
    h_output = gru_cell(gru_x, state_ref[...], (0, o1), (o3, o4),
                        ROW_B_IH_GRU, ROW_B_HH_GRU)
    h_output_norm = layer_norm(h_output, ROW_LN_GRU)

    # ---------------- ATTENTION ----------------
    # fused query projection for motion + visual heads
    q_lang = mm(h_output_norm, wh_lang_ref[...]) + vrow(ROW_BH_LANG, 0, 2 * A)
    h_motion = attend(q_lang[:, 0:A], fc_ref[...], p_fc_ref[...], ROW_WA_MOTION)
    h_visual = attend(q_lang[:, A:2 * A], attf_ref[...], p_attf_ref[...],
                      ROW_WA_VISUAL)

    # ---------------- ATTENTION GRU ----------------
    att_x = jnp.concatenate([h_motion, h_visual, h_output_norm], axis=-1)
    att_state = gru_cell(att_x, att_prev_ref[...], (o1, o2), (o4, o5),
                         ROW_B_IH_ATT, ROW_B_HH_ATT)
    att_out_norm = layer_norm(att_state, ROW_LN_ATT)

    # ---------------- MOTION / VISUAL / TEXT CONTEXT ----------------
    motion_feats = motion_ref[...]
    visual_feats = visual_ref[...]
    text_feats = text_ref[...]
    p_motion_t, p_motion_new = project(motion_feats, h_motion,
                                       w2att_ref[0:R, :],
                                       vrow(ROW_B_2ATT, 0, A))
    p_visual_t, p_visual_new = project(visual_feats, h_visual,
                                       w2att_ref[R:2 * R, :],
                                       vrow(ROW_B_2ATT, A, 2 * A))
    p_text_t, p_text_new = project(text_feats, h_output_norm,
                                   w2att_ref[2 * R:3 * R, :],
                                   vrow(ROW_B_2ATT, 2 * A, 3 * A))

    # fused query projection for the three context heads
    q_ctx = mm(att_out_norm, wh_ctx_ref[...]) + vrow(ROW_BH_CTX, 0, 3 * A)
    ctx_motion = attend_plus1(q_ctx[:, 0:A], motion_feats, p_motion_t,
                              h_motion, p_motion_new, ROW_WA_CM)
    ctx_visual = attend_plus1(q_ctx[:, A:2 * A], visual_feats, p_visual_t,
                              h_visual, p_visual_new, ROW_WA_CV)
    ctx_text = attend_plus1(q_ctx[:, 2 * A:3 * A], text_feats, p_text_t,
                            h_output_norm, p_text_new, ROW_WA_CT)

    # ---------------- SMAN GRU ----------------
    sman_x = jnp.concatenate([ctx_motion, ctx_visual, ctx_text, att_out_norm],
                             axis=-1)
    sman_state = gru_cell(sman_x, sman_prev_ref[...], (o2, o3), (o5, o6),
                          ROW_B_IH_SMAN, ROW_B_HH_SMAN)
    sman_out_norm = layer_norm(sman_state, ROW_LN_SMAN)

    # ---------------- OUTPUT ----------------
    # fused block-diagonal logit heads (dropout = identity in eval mode)
    heads_in = jnp.concatenate([h_output_norm, att_out_norm, sman_out_norm],
                               axis=-1)                                # (B, 3R)
    logits = (mm(heads_in, w_logit_ref[0:3 * R, :])
              + w_logit_ref[3 * R:3 * R + 1, :])                       # (B, 384)

    pieces = [logits, h_output_norm, att_out_norm, sman_out_norm,
              h_motion, h_visual]
    pad = out_ref.shape[-1] - (logits.shape[-1] + 5 * R)
    if pad > 0:
        pieces.append(jnp.zeros((B, pad), jnp.float32))
    out_ref[...] = jnp.concatenate(pieces, axis=-1)    # single lane-dense store


# ----------------------------- parameters ---------------------------------- #

def init_params(key, *, vocab_size, E, R, A):
    V1 = vocab_size + 1
    G = 3 * R
    assert G <= 128 and 3 * A <= 128 and 2 * A <= 128 and V1 <= LOGIT_PAD

    keys = iter(jax.random.split(key, 64))

    def nrm(shape, scale=0.1):
        return scale * jax.random.normal(next(keys), shape, dtype=jnp.float32)

    def pad_row(parts, width=128):
        x = jnp.concatenate(parts, axis=-1)
        return jnp.pad(x, ((0, 0), (0, width - x.shape[-1])))

    embed_w = nrm((V1, E))

    # GRU slab: [gru W_ih | att W_ih | sman W_ih | gru W_hh | att W_hh | sman W_hh],
    # all pre-transposed to (in, 3R) with gate order [r | z | n] along out dim.
    w_gru = jnp.concatenate([
        nrm((E + 3 * R, G)),   # language GRU: x = [xt | mean_fc | mean_att | sman]
        nrm((3 * R, G)),       # attention GRU: x = [h_motion | h_visual | h_norm]
        nrm((4 * R, G)),       # SMAN GRU: x = [ctx_m | ctx_v | ctx_t | att_norm]
        nrm((R, G)),           # language GRU W_hh
        nrm((R, G)),           # attention GRU W_hh
        nrm((R, G)),           # SMAN GRU W_hh
    ], axis=0)

    # fused attention-query projections
    wh_lang = jnp.concatenate([nrm((R, A)), nrm((R, A))], axis=1)      # motion | visual
    wh_ctx = jnp.concatenate([nrm((R, A)), nrm((R, A)), nrm((R, A))], axis=1)

    # motion2att | visual2att | text2att stacked along rows
    w2att = jnp.concatenate([nrm((R, A)), nrm((R, A)), nrm((R, A))], axis=0)

    # block-diagonal fused logit heads, each padded to LOGIT_PAD lanes
    def head():
        w = jnp.pad(nrm((R, V1)), ((0, 0), (0, LOGIT_PAD - V1)))
        b = jnp.pad(nrm((1, V1), 0.01), ((0, 0), (0, LOGIT_PAD - V1)))
        return w, b
    (w1, b1), (w2, b2), (w3, b3) = head(), head(), head()
    zblk = jnp.zeros((R, LOGIT_PAD), jnp.float32)
    w_logit = jnp.concatenate([
        jnp.concatenate([w1, zblk, zblk], axis=1),
        jnp.concatenate([zblk, w2, zblk], axis=1),
        jnp.concatenate([zblk, zblk, w3], axis=1),
        jnp.concatenate([b1, b2, b3], axis=1),         # bias row (row index 3R)
    ], axis=0)

    # packed bias / LayerNorm / alpha_net slab, one row per parameter group
    ones_r = jnp.ones((1, R), jnp.float32)
    zeros_r = jnp.zeros((1, R), jnp.float32)
    rows = [None] * VEC_ROWS
    rows[ROW_B_IH_GRU] = pad_row([nrm((1, G), 0.01)])
    rows[ROW_B_HH_GRU] = pad_row([nrm((1, G), 0.01)])
    rows[ROW_B_IH_ATT] = pad_row([nrm((1, G), 0.01)])
    rows[ROW_B_HH_ATT] = pad_row([nrm((1, G), 0.01)])
    rows[ROW_B_IH_SMAN] = pad_row([nrm((1, G), 0.01)])
    rows[ROW_B_HH_SMAN] = pad_row([nrm((1, G), 0.01)])
    rows[ROW_LN_GRU] = pad_row([ones_r, zeros_r])      # [gamma | beta]
    rows[ROW_LN_ATT] = pad_row([ones_r, zeros_r])
    rows[ROW_LN_SMAN] = pad_row([ones_r, zeros_r])
    rows[ROW_BH_LANG] = pad_row([nrm((1, A), 0.01), nrm((1, A), 0.01)])
    rows[ROW_BH_CTX] = pad_row([nrm((1, A), 0.01), nrm((1, A), 0.01),
                                nrm((1, A), 0.01)])
    for r in (ROW_WA_MOTION, ROW_WA_VISUAL, ROW_WA_CM, ROW_WA_CV, ROW_WA_CT):
        rows[r] = pad_row([nrm((1, A)), nrm((1, 1), 0.01)])  # [alpha_net w | b]
    rows[ROW_B_2ATT] = pad_row([nrm((1, A), 0.01), nrm((1, A), 0.01),
                                nrm((1, A), 0.01)])
    vec = jnp.concatenate(rows, axis=0)                # (VEC_ROWS, 128)

    return {"embed_w": embed_w, "w_gru": w_gru, "wh_lang": wh_lang,
            "wh_ctx": wh_ctx, "w2att": w2att, "w_logit": w_logit, "vec": vec}


# ----------------------------- Core forward -------------------------------- #

@jax.jit
def core_forward(params, it, mean_fc_feats, fc_feats, p_fc_feats,
                 mean_att_feats, att_feats, p_att_feats, state,
                 att_out, sman_out, motion_feats, visual_feats, text_feats):
    B, R = state.shape
    V1 = params["embed_w"].shape[0]
    n_logit = params["w_logit"].shape[-1]              # 3 * LOGIT_PAD
    out_w = n_logit + pl.cdiv(5 * R, 128) * 128        # lane-dense packed output

    out = pl.pallas_call(
        _core_kernel,
        out_shape=jax.ShapeDtypeStruct((B, out_w), jnp.float32),
        in_specs=[SMEM_SPEC] + [VMEM_SPEC] * 19,
        out_specs=VMEM_SPEC,
    )(it.astype(jnp.int32), params["embed_w"],
      mean_fc_feats, mean_att_feats, state, att_out, sman_out,
      fc_feats, p_fc_feats, att_feats, p_att_feats,
      motion_feats, visual_feats, text_feats,
      params["w_gru"], params["wh_lang"], params["wh_ctx"],
      params["w2att"], params["w_logit"], params["vec"])

    s0 = n_logit
    logit_h = out[:, 0:V1]
    logit_att = out[:, LOGIT_PAD:LOGIT_PAD + V1]
    logit_sman = out[:, 2 * LOGIT_PAD:2 * LOGIT_PAD + V1]
    h_norm = out[:, s0:s0 + R]
    a_norm = out[:, s0 + R:s0 + 2 * R]
    s_norm = out[:, s0 + 2 * R:s0 + 3 * R]
    h_motion = out[:, s0 + 3 * R:s0 + 4 * R]
    h_visual = out[:, s0 + 4 * R:s0 + 5 * R]
    return (logit_h, logit_att, logit_sman, h_norm, a_norm, s_norm,
            h_motion, h_visual, h_norm)


# ------------------------------- main --------------------------------------- #

if __name__ == "__main__":
    B = 2            # batch
    R = 32           # rnn_size == feature_size
    A = 32           # att_hid_size
    E = 32           # input_encoding_size
    VOCAB = 49       # vocab_size  (embedding / logits use VOCAB + 1 = 50)
    L_FC = 8         # motion feature locations
    L_ATT = 8        # visual feature locations
    T = 4            # context history length

    root = jax.random.PRNGKey(0)
    pkey, dkey = jax.random.split(root)
    params = init_params(pkey, vocab_size=VOCAB, E=E, R=R, A=A)

    ks = iter(jax.random.split(dkey, 16))
    it = jax.random.randint(next(ks), (B,), 0, VOCAB + 1, dtype=jnp.int32)
    mean_fc_feats = jax.random.normal(next(ks), (B, R), jnp.float32)
    fc_feats = jax.random.normal(next(ks), (B, L_FC, R), jnp.float32)
    p_fc_feats = jax.random.normal(next(ks), (B, L_FC, A), jnp.float32)
    mean_att_feats = jax.random.normal(next(ks), (B, R), jnp.float32)
    att_feats = jax.random.normal(next(ks), (B, L_ATT, R), jnp.float32)
    p_att_feats = jax.random.normal(next(ks), (B, L_ATT, A), jnp.float32)
    state = jax.random.normal(next(ks), (B, R), jnp.float32)
    att_out = jax.random.normal(next(ks), (B, R), jnp.float32)
    sman_out = jax.random.normal(next(ks), (B, R), jnp.float32)
    motion_feats = jax.random.normal(next(ks), (B, T, R), jnp.float32)
    visual_feats = jax.random.normal(next(ks), (B, T, R), jnp.float32)
    text_feats = jax.random.normal(next(ks), (B, T, R), jnp.float32)

    outs = core_forward(params, it, mean_fc_feats, fc_feats, p_fc_feats,
                        mean_att_feats, att_feats, p_att_feats, state,
                        att_out, sman_out, motion_feats, visual_feats,
                        text_feats)
    outs = jax.block_until_ready(outs)

    assert outs[0].shape == (B, VOCAB + 1)
    assert outs[1].shape == (B, VOCAB + 1)
    assert outs[2].shape == (B, VOCAB + 1)
    assert all(o.shape == (B, R) for o in outs[3:])
    assert all(bool(jnp.all(jnp.isfinite(o))) for o in outs)
    print("KERNEL_OK")
</pallas_src>

<mosaic_0001>
module attributes {stable_mosaic.version = 11 : i64} {
  func.func @_core_kernel(%arg0: memref<2xi32, #tpu.memory_space<smem>>, %arg1: memref<50x32xf32, #tpu.memory_space<vmem>>, %arg2: memref<2x32xf32, #tpu.memory_space<vmem>>, %arg3: memref<2x32xf32, #tpu.memory_space<vmem>>, %arg4: memref<2x32xf32, #tpu.memory_space<vmem>>, %arg5: memref<2x32xf32, #tpu.memory_space<vmem>>, %arg6: memref<2x32xf32, #tpu.memory_space<vmem>>, %arg7: memref<2x8x32xf32, #tpu.memory_space<vmem>>, %arg8: memref<2x8x32xf32, #tpu.memory_space<vmem>>, %arg9: memref<2x8x32xf32, #tpu.memory_space<vmem>>, %arg10: memref<2x8x32xf32, #tpu.memory_space<vmem>>, %arg11: memref<2x4x32xf32, #tpu.memory_space<vmem>>, %arg12: memref<2x4x32xf32, #tpu.memory_space<vmem>>, %arg13: memref<2x4x32xf32, #tpu.memory_space<vmem>>, %arg14: memref<448x96xf32, #tpu.memory_space<vmem>>, %arg15: memref<32x64xf32, #tpu.memory_space<vmem>>, %arg16: memref<32x96xf32, #tpu.memory_space<vmem>>, %arg17: memref<96x32xf32, #tpu.memory_space<vmem>>, %arg18: memref<97x384xf32, #tpu.memory_space<vmem>>, %arg19: memref<17x128xf32, #tpu.memory_space<vmem>>, %arg20: memref<2x640xf32, #tpu.memory_space<vmem>>) attributes {dimension_semantics = [], scalar_prefetch = 0 : i64, scratch_operands = 0 : i64, tpu.core_type = #tpu.core_type<tc>} {
    %c0 = arith.constant 0 : index
    %0 = memref.load %arg0[%c0] : memref<2xi32, #tpu.memory_space<smem>>
    %1 = arith.index_cast %0 : i32 to index
    %c0_0 = arith.constant 0 : index
    %2 = vector.load %arg1[%1, %c0_0] : memref<50x32xf32, #tpu.memory_space<vmem>>, vector<1x32xf32>
    %c1 = arith.constant 1 : index
    %3 = memref.load %arg0[%c1] : memref<2xi32, #tpu.memory_space<smem>>
    %4 = arith.index_cast %3 : i32 to index
    %c0_1 = arith.constant 0 : index
    %5 = vector.load %arg1[%4, %c0_1] : memref<50x32xf32, #tpu.memory_space<vmem>>, vector<1x32xf32>
    %6 = tpu.concatenate %2, %5 in 0 : vector<1x32xf32>, vector<1x32xf32> -> vector<2x32xf32>
    %cst = arith.constant 0.000000e+00 : f32
    %7 = vector.broadcast %cst : f32 to vector<2x32xf32>
    %8 = arith.maximumf %6, %7 : vector<2x32xf32>
    %c0_2 = arith.constant 0 : index
    %c0_3 = arith.constant 0 : index
    %9 = vector.load %arg2[%c0_2, %c0_3] : memref<2x32xf32, #tpu.memory_space<vmem>>, vector<2x32xf32>
    %c0_4 = arith.constant 0 : index
    %c0_5 = arith.constant 0 : index
    %10 = vector.load %arg3[%c0_4, %c0_5] : memref<2x32xf32, #tpu.memory_space<vmem>>, vector<2x32xf32>
    %c0_6 = arith.constant 0 : index
    %c0_7 = arith.constant 0 : index
    %11 = vector.load %arg6[%c0_6, %c0_7] : memref<2x32xf32, #tpu.memory_space<vmem>>, vector<2x32xf32>
    %12 = tpu.concatenate %8, %9, %10, %11 in 1 : vector<2x32xf32>, vector<2x32xf32>, vector<2x32xf32>, vector<2x32xf32> -> vector<2x128xf32>
    %c0_8 = arith.constant 0 : index
    %c0_9 = arith.constant 0 : index
    %13 = vector.load %arg4[%c0_8, %c0_9] : memref<2x32xf32, #tpu.memory_space<vmem>>, vector<2x32xf32>
    %c0_10 = arith.constant 0 : index
    %c0_11 = arith.constant 0 : index
    %14 = vector.load %arg14[%c0_10, %c0_11] : memref<448x96xf32, #tpu.memory_space<vmem>>, vector<128x96xf32>
    %cst_12 = arith.constant dense<0.000000e+00> : vector<2x96xf32>
    %15 = tpu.matmul %12, %14, %cst_12 {dimension_numbers = #tpu.dot_dimension_numbers<[1], [0], [0], [1], [0, 0, 1, 1], [], []>} : vector<2x128xf32>, vector<128x96xf32>, vector<2x96xf32> -> vector<2x96xf32>
    %c0_13 = arith.constant 0 : index
    %c0_14 = arith.constant 0 : index
    %16 = vector.load %arg19[%c0_13, %c0_14] : memref<17x128xf32, #tpu.memory_space<vmem>>, vector<1x96xf32>
    %17 = vector.broadcast %16 : vector<1x96xf32> to vector<2x96xf32>
    %18 = arith.addf %15, %17 : vector<2x96xf32>
    %c352 = arith.constant 352 : index
    %c0_15 = arith.constant 0 : index
    %19 = vector.load %arg14[%c352, %c0_15] : memref<448x96xf32, #tpu.memory_space<vmem>>, vector<32x96xf32>
    %cst_16 = arith.constant dense<0.000000e+00> : vector<2x96xf32>
    %20 = tpu.matmul %13, %19, %cst_16 {dimension_numbers = #tpu.dot_dimension_numbers<[1], [0], [0], [1], [0, 0, 1, 1], [], []>} : vector<2x32xf32>, vector<32x96xf32>, vector<2x96xf32> -> vector<2x96xf32>
    %c1_17 = arith.constant 1 : index
    %c0_18 = arith.constant 0 : index
    %21 = vector.load %arg19[%c1_17, %c0_18] : memref<17x128xf32, #tpu.memory_space<vmem>>, vector<1x96xf32>
    %22 = vector.broadcast %21 : vector<1x96xf32> to vector<2x96xf32>
    %23 = arith.addf %20, %22 : vector<2x96xf32>
    %24 = vector.extract_strided_slice %18 {offsets = [0, 0], sizes = [2, 32], strides = [1, 1]} : vector<2x96xf32> to vector<2x32xf32>
    %25 = vector.extract_strided_slice %23 {offsets = [0, 0], sizes = [2, 32], strides = [1, 1]} : vector<2x96xf32> to vector<2x32xf32>
    %26 = arith.addf %24, %25 : vector<2x32xf32>
    %27 = arith.negf %26 : vector<2x32xf32>
    %28 = math.exp %27 : vector<2x32xf32>
    %cst_19 = arith.constant 1.000000e+00 : f32
    %29 = vector.broadcast %cst_19 : f32 to vector<2x32xf32>
    %30 = arith.addf %29, %28 : vector<2x32xf32>
    %31 = arith.divf %29, %30 : vector<2x32xf32>
    %32 = vector.extract_strided_slice %18 {offsets = [0, 32], sizes = [2, 32], strides = [1, 1]} : vector<2x96xf32> to vector<2x32xf32>
    %33 = vector.extract_strided_slice %23 {offsets = [0, 32], sizes = [2, 32], strides = [1, 1]} : vector<2x96xf32> to vector<2x32xf32>
    %34 = arith.addf %32, %33 : vector<2x32xf32>
    %35 = arith.negf %34 : vector<2x32xf32>
    %36 = math.exp %35 : vector<2x32xf32>
    %cst_20 = arith.constant 1.000000e+00 : f32
    %37 = vector.broadcast %cst_20 : f32 to vector<2x32xf32>
    %38 = arith.addf %37, %36 : vector<2x32xf32>
    %39 = arith.divf %37, %38 : vector<2x32xf32>
    %40 = vector.extract_strided_slice %18 {offsets = [0, 64], sizes = [2, 32], strides = [1, 1]} : vector<2x96xf32> to vector<2x32xf32>
    %41 = vector.extract_strided_slice %23 {offsets = [0, 64], sizes = [2, 32], strides = [1, 1]} : vector<2x96xf32> to vector<2x32xf32>
    %42 = arith.mulf %31, %41 : vector<2x32xf32>
    %43 = arith.addf %40, %42 : vector<2x32xf32>
    %44 = math.tanh %43 : vector<2x32xf32>
    %cst_21 = arith.constant 1.000000e+00 : f32
    %45 = vector.broadcast %cst_21 : f32 to vector<2x32xf32>
    %46 = arith.subf %45, %39 : vector<2x32xf32>
    %47 = arith.mulf %46, %44 : vector<2x32xf32>
    %48 = arith.mulf %39, %13 : vector<2x32xf32>
    %49 = arith.addf %47, %48 : vector<2x32xf32>
    %c6 = arith.constant 6 : index
    %c0_22 = arith.constant 0 : index
    %50 = vector.load %arg19[%c6, %c0_22] : memref<17x128xf32, #tpu.memory_space<vmem>>, vector<1x32xf32>
    %c6_23 = arith.constant 6 : index
    %c32 = arith.constant 32 : index
    %51 = vector.load %arg19[%c6_23, %c32] : memref<17x128xf32, #tpu.memory_space<vmem>>, vector<1x32xf32>
    %cst_24 = arith.constant dense<0.000000e+00> : vector<2xf32>
    %52 = vector.multi_reduction <add>, %49, %cst_24 [1] : vector<2x32xf32> to vector<2xf32>
    %53 = vector.shape_cast %52 : vector<2xf32> to vector<2x1xf32>
    %cst_25 = arith.constant 3.200000e+01 : f32
    %54 = vector.broadcast %cst_25 : f32 to vector<2x1xf32>
    %55 = arith.divf %53, %54 : vector<2x1xf32>
    %56 = vector.broadcast %55 : vector<2x1xf32> to vector<2x32xf32>
    %57 = arith.subf %49, %56 : vector<2x32xf32>
    %58 = arith.mulf %57, %57 : vector<2x32xf32>
    %cst_26 = arith.constant dense<0.000000e+00> : vector<2xf32>
    %59 = vector.multi_reduction <add>, %58, %cst_26 [1] : vector<2x32xf32> to vector<2xf32>
    %60 = vector.shape_cast %59 : vector<2xf32> to vector<2x1xf32>
    %cst_27 = arith.constant 3.200000e+01 : f32
    %61 = vector.broadcast %cst_27 : f32 to vector<2x1xf32>
    %62 = arith.divf %60, %61 : vector<2x1xf32>
    %63 = vector.broadcast %55 : vector<2x1xf32> to vector<2x32xf32>
    %64 = arith.subf %49, %63 : vector<2x32xf32>
    %cst_28 = arith.constant 9.99999974E-6 : f32
    %65 = vector.broadcast %cst_28 : f32 to vector<2x1xf32>
    %66 = arith.addf %62, %65 : vector<2x1xf32>
    %67 = math.rsqrt %66 : vector<2x1xf32>
    %68 = vector.broadcast %67 : vector<2x1xf32> to vector<2x32xf32>
    %69 = arith.mulf %64, %68 : vector<2x32xf32>
    %70 = vector.broadcast %50 : vector<1x32xf32> to vector<2x32xf32>
    %71 = arith.mulf %69, %70 : vector<2x32xf32>
    %72 = vector.broadcast %51 : vector<1x32xf32> to vector<2x32xf32>
    %73 = arith.addf %71, %72 : vector<2x32xf32>
    %c0_29 = arith.constant 0 : index
    %c0_30 = arith.constant 0 : index
    %74 = vector.load %arg15[%c0_29, %c0_30] : memref<32x64xf32, #tpu.memory_space<vmem>>, vector<32x64xf32>
    %cst_31 = arith.constant dense<0.000000e+00> : vector<2x64xf32>
    %75 = tpu.matmul %73, %74, %cst_31 {dimension_numbers = #tpu.dot_dimension_numbers<[1], [0], [0], [1], [0, 0, 1, 1], [], []>} : vector<2x32xf32>, vector<32x64xf32>, vector<2x64xf32> -> vector<2x64xf32>
    %c9 = arith.constant 9 : index
    %c0_32 = arith.constant 0 : index
    %76 = vector.load %arg19[%c9, %c0_32] : memref<17x128xf32, #tpu.memory_space<vmem>>, vector<1x64xf32>
    %77 = vector.broadcast %76 : vector<1x64xf32> to vector<2x64xf32>
    %78 = arith.addf %75, %77 : vector<2x64xf32>
    %79 = vector.extract_strided_slice %78 {offsets = [0, 0], sizes = [2, 32], strides = [1, 1]} : vector<2x64xf32> to vector<2x32xf32>
    %c0_33 = arith.constant 0 : index
    %c0_34 = arith.constant 0 : index
    %c0_35 = arith.constant 0 : index
    %80 = vector.load %arg7[%c0_33, %c0_34, %c0_35] : memref<2x8x32xf32, #tpu.memory_space<vmem>>, vector<2x8x32xf32>
    %c0_36 = arith.constant 0 : index
    %c0_37 = arith.constant 0 : index
    %c0_38 = arith.constant 0 : index
    %81 = vector.load %arg8[%c0_36, %c0_37, %c0_38] : memref<2x8x32xf32, #tpu.memory_space<vmem>>, vector<2x8x32xf32>
    %c11 = arith.constant 11 : index
    %c0_39 = arith.constant 0 : index
    %82 = vector.load %arg19[%c11, %c0_39] : memref<17x128xf32, #tpu.memory_space<vmem>>, vector<1x32xf32>
    %c11_40 = arith.constant 11 : index
    %c32_41 = arith.constant 32 : index
    %83 = vector.load %arg19[%c11_40, %c32_41] : memref<17x128xf32, #tpu.memory_space<vmem>>, vector<1x1xf32>
    %84 = vector.shape_cast %79 : vector<2x32xf32> to vector<2x1x32xf32>
    %85 = vector.broadcast %84 : vector<2x1x32xf32> to vector<2x8x32xf32>
    %86 = arith.addf %81, %85 : vector<2x8x32xf32>
    %87 = math.tanh %86 : vector<2x8x32xf32>
    %88 = vector.shape_cast %82 : vector<1x32xf32> to vector<1x1x32xf32>
    %89 = vector.broadcast %88 : vector<1x1x32xf32> to vector<2x8x32xf32>
    %90 = arith.mulf %87, %89 : vector<2x8x32xf32>
    %cst_42 = arith.constant dense<0.000000e+00> : vector<2x8xf32>
    %91 = vector.multi_reduction <add>, %90, %cst_42 [2] : vector<2x8x32xf32> to vector<2x8xf32>
    %92 = vector.broadcast %83 : vector<1x1xf32> to vector<2x8xf32>
    %93 = arith.addf %91, %92 : vector<2x8xf32>
    %cst_43 = arith.constant dense<0xFF800000> : vector<2xf32>
    %94 = vector.multi_reduction <maximumf>, %93, %cst_43 [1] : vector<2x8xf32> to vector<2xf32>
    %95 = vector.shape_cast %94 : vector<2xf32> to vector<2x1xf32>
    %96 = vector.broadcast %95 : vector<2x1xf32> to vector<2x8xf32>
    %97 = arith.subf %93, %96 : vector<2x8xf32>
    %98 = math.exp %97 : vector<2x8xf32>
    %cst_44 = arith.constant dense<0.000000e+00> : vector<2xf32>
    %99 = vector.multi_reduction <add>, %98, %cst_44 [1] : vector<2x8xf32> to vector<2xf32>
    %100 = vector.shape_cast %99 : vector<2xf32> to vector<2x1xf32>
    %101 = vector.broadcast %100 : vector<2x1xf32> to vector<2x8xf32>
    %102 = arith.divf %98, %101 : vector<2x8xf32>
    %103 = vector.shape_cast %102 : vector<2x8xf32> to vector<2x8x1xf32>
    %104 = vector.broadcast %103 : vector<2x8x1xf32> to vector<2x8x32xf32>
    %105 = arith.mulf %104, %80 : vector<2x8x32xf32>
    %cst_45 = arith.constant dense<0.000000e+00> : vector<2x32xf32>
    %106 = vector.multi_reduction <add>, %105, %cst_45 [1] : vector<2x8x32xf32> to vector<2x32xf32>
    %107 = vector.extract_strided_slice %78 {offsets = [0, 32], sizes = [2, 32], strides = [1, 1]} : vector<2x64xf32> to vector<2x32xf32>
    %c0_46 = arith.constant 0 : index
    %c0_47 = arith.constant 0 : index
    %c0_48 = arith.constant 0 : index
    %108 = vector.load %arg9[%c0_46, %c0_47, %c0_48] : memref<2x8x32xf32, #tpu.memory_space<vmem>>, vector<2x8x32xf32>
    %c0_49 = arith.constant 0 : index
    %c0_50 = arith.constant 0 : index
    %c0_51 = arith.constant 0 : index
    %109 = vector.load %arg10[%c0_49, %c0_50, %c0_51] : memref<2x8x32xf32, #tpu.memory_space<vmem>>, vector<2x8x32xf32>
    %c12 = arith.constant 12 : index
    %c0_52 = arith.constant 0 : index
    %110 = vector.load %arg19[%c12, %c0_52] : memref<17x128xf32, #tpu.memory_space<vmem>>, vector<1x32xf32>
    %c12_53 = arith.constant 12 : index
    %c32_54 = arith.constant 32 : index
    %111 = vector.load %arg19[%c12_53, %c32_54] : memref<17x128xf32, #tpu.memory_space<vmem>>, vector<1x1xf32>
    %112 = vector.shape_cast %107 : vector<2x32xf32> to vector<2x1x32xf32>
    %113 = vector.broadcast %112 : vector<2x1x32xf32> to vector<2x8x32xf32>
    %114 = arith.addf %109, %113 : vector<2x8x32xf32>
    %115 = math.tanh %114 : vector<2x8x32xf32>
    %116 = vector.shape_cast %110 : vector<1x32xf32> to vector<1x1x32xf32>
    %117 = vector.broadcast %116 : vector<1x1x32xf32> to vector<2x8x32xf32>
    %118 = arith.mulf %115, %117 : vector<2x8x32xf32>
    %cst_55 = arith.constant dense<0.000000e+00> : vector<2x8xf32>
    %119 = vector.multi_reduction <add>, %118, %cst_55 [2] : vector<2x8x32xf32> to vector<2x8xf32>
    %120 = vector.broadcast %111 : vector<1x1xf32> to vector<2x8xf32>
    %121 = arith.addf %119, %120 : vector<2x8xf32>
    %cst_56 = arith.constant dense<0xFF800000> : vector<2xf32>
    %122 = vector.multi_reduction <maximumf>, %121, %cst_56 [1] : vector<2x8xf32> to vector<2xf32>
    %123 = vector.shape_cast %122 : vector<2xf32> to vector<2x1xf32>
    %124 = vector.broadcast %123 : vector<2x1xf32> to vector<2x8xf32>
    %125 = arith.subf %121, %124 : vector<2x8xf32>
    %126 = math.exp %125 : vector<2x8xf32>
    %cst_57 = arith.constant dense<0.000000e+00> : vector<2xf32>
    %127 = vector.multi_reduction <add>, %126, %cst_57 [1] : vector<2x8xf32> to vector<2xf32>
    %128 = vector.shape_cast %127 : vector<2xf32> to vector<2x1xf32>
    %129 = vector.broadcast %128 : vector<2x1xf32> to vector<2x8xf32>
    %130 = arith.divf %126, %129 : vector<2x8xf32>
    %131 = vector.shape_cast %130 : vector<2x8xf32> to vector<2x8x1xf32>
    %132 = vector.broadcast %131 : vector<2x8x1xf32> to vector<2x8x32xf32>
    %133 = arith.mulf %132, %108 : vector<2x8x32xf32>
    %cst_58 = arith.constant dense<0.000000e+00> : vector<2x32xf32>
    %134 = vector.multi_reduction <add>, %133, %cst_58 [1] : vector<2x8x32xf32> to vector<2x32xf32>
    %135 = tpu.concatenate %106, %134, %73 in 1 : vector<2x32xf32>, vector<2x32xf32>, vector<2x32xf32> -> vector<2x96xf32>
    %c0_59 = arith.constant 0 : index
    %c0_60 = arith.constant 0 : index
    %136 = vector.load %arg5[%c0_59, %c0_60] : memref<2x32xf32, #tpu.memory_space<vmem>>, vector<2x32xf32>
    %c128 = arith.constant 128 : index
    %c0_61 = arith.constant 0 : index
    %137 = vector.load %arg14[%c128, %c0_61] : memref<448x96xf32, #tpu.memory_space<vmem>>, vector<96x96xf32>
    %cst_62 = arith.constant dense<0.000000e+00> : vector<2x96xf32>
    %138 = tpu.matmul %135, %137, %cst_62 {dimension_numbers = #tpu.dot_dimension_numbers<[1], [0], [0], [1], [0, 0, 1, 1], [], []>} : vector<2x96xf32>, vector<96x96xf32>, vector<2x96xf32> -> vector<2x96xf32>
    %c2 = arith.constant 2 : index
    %c0_63 = arith.constant 0 : index
    %139 = vector.load %arg19[%c2, %c0_63] : memref<17x128xf32, #tpu.memory_space<vmem>>, vector<1x96xf32>
    %140 = vector.broadcast %139 : vector<1x96xf32> to vector<2x96xf32>
    %141 = arith.addf %138, %140 : vector<2x96xf32>
    %c384 = arith.constant 384 : index
    %c0_64 = arith.constant 0 : index
    %142 = vector.load %arg14[%c384, %c0_64] : memref<448x96xf32, #tpu.memory_space<vmem>>, vector<32x96xf32>
    %cst_65 = arith.constant dense<0.000000e+00> : vector<2x96xf32>
    %143 = tpu.matmul %136, %142, %cst_65 {dimension_numbers = #tpu.dot_dimension_numbers<[1], [0], [0], [1], [0, 0, 1, 1], [], []>} : vector<2x32xf32>, vector<32x96xf32>, vector<2x96xf32> -> vector<2x96xf32>
    %c3 = arith.constant 3 : index
    %c0_66 = arith.constant 0 : index
    %144 = vector.load %arg19[%c3, %c0_66] : memref<17x128xf32, #tpu.memory_space<vmem>>, vector<1x96xf32>
    %145 = vector.broadcast %144 : vector<1x96xf32> to vector<2x96xf32>
    %146 = arith.addf %143, %145 : vector<2x96xf32>
    %147 = vector.extract_strided_slice %141 {offsets = [0, 0], sizes = [2, 32], strides = [1, 1]} : vector<2x96xf32> to vector<2x32xf32>
    %148 = vector.extract_strided_slice %146 {offsets = [0, 0], sizes = [2, 32], strides = [1, 1]} : vector<2x96xf32> to vector<2x32xf32>
    %149 = arith.addf %147, %148 : vector<2x32xf32>
    %150 = arith.negf %149 : vector<2x32xf32>
    %151 = math.exp %150 : vector<2x32xf32>
    %cst_67 = arith.constant 1.000000e+00 : f32
    %152 = vector.broadcast %cst_67 : f32 to vector<2x32xf32>
    %153 = arith.addf %152, %151 : vector<2x32xf32>
    %154 = arith.divf %152, %153 : vector<2x32xf32>
    %155 = vector.extract_strided_slice %141 {offsets = [0, 32], sizes = [2, 32], strides = [1, 1]} : vector<2x96xf32> to vector<2x32xf32>
    %156 = vector.extract_strided_slice %146 {offsets = [0, 32], sizes = [2, 32], strides = [1, 1]} : vector<2x96xf32> to vector<2x32xf32>
    %157 = arith.addf %155, %156 : vector<2x32xf32>
    %158 = arith.negf %157 : vector<2x32xf32>
    %159 = math.exp %158 : vector<2x32xf32>
    %cst_68 = arith.constant 1.000000e+00 : f32
    %160 = vector.broadcast %cst_68 : f32 to vector<2x32xf32>
    %161 = arith.addf %160, %159 : vector<2x32xf32>
    %162 = arith.divf %160, %161 : vector<2x32xf32>
    %163 = vector.extract_strided_slice %141 {offsets = [0, 64], sizes = [2, 32], strides = [1, 1]} : vector<2x96xf32> to vector<2x32xf32>
    %164 = vector.extract_strided_slice %146 {offsets = [0, 64], sizes = [2, 32], strides = [1, 1]} : vector<2x96xf32> to vector<2x32xf32>
    %165 = arith.mulf %154, %164 : vector<2x32xf32>
    %166 = arith.addf %163, %165 : vector<2x32xf32>
    %167 = math.tanh %166 : vector<2x32xf32>
    %cst_69 = arith.constant 1.000000e+00 : f32
    %168 = vector.broadcast %cst_69 : f32 to vector<2x32xf32>
    %169 = arith.subf %168, %162 : vector<2x32xf32>
    %170 = arith.mulf %169, %167 : vector<2x32xf32>
    %171 = arith.mulf %162, %136 : vector<2x32xf32>
    %172 = arith.addf %170, %171 : vector<2x32xf32>
    %c7 = arith.constant 7 : index
    %c0_70 = arith.constant 0 : index
    %173 = vector.load %arg19[%c7, %c0_70] : memref<17x128xf32, #tpu.memory_space<vmem>>, vector<1x32xf32>
    %c7_71 = arith.constant 7 : index
    %c32_72 = arith.constant 32 : index
    %174 = vector.load %arg19[%c7_71, %c32_72] : memref<17x128xf32, #tpu.memory_space<vmem>>, vector<1x32xf32>
    %cst_73 = arith.constant dense<0.000000e+00> : vector<2xf32>
    %175 = vector.multi_reduction <add>, %172, %cst_73 [1] : vector<2x32xf32> to vector<2xf32>
    %176 = vector.shape_cast %175 : vector<2xf32> to vector<2x1xf32>
    %cst_74 = arith.constant 3.200000e+01 : f32
    %177 = vector.broadcast %cst_74 : f32 to vector<2x1xf32>
    %178 = arith.divf %176, %177 : vector<2x1xf32>
    %179 = vector.broadcast %178 : vector<2x1xf32> to vector<2x32xf32>
    %180 = arith.subf %172, %179 : vector<2x32xf32>
    %181 = arith.mulf %180, %180 : vector<2x32xf32>
    %cst_75 = arith.constant dense<0.000000e+00> : vector<2xf32>
    %182 = vector.multi_reduction <add>, %181, %cst_75 [1] : vector<2x32xf32> to vector<2xf32>
    %183 = vector.shape_cast %182 : vector<2xf32> to vector<2x1xf32>
    %cst_76 = arith.constant 3.200000e+01 : f32
    %184 = vector.broadcast %cst_76 : f32 to vector<2x1xf32>
    %185 = arith.divf %183, %184 : vector<2x1xf32>
    %186 = vector.broadcast %178 : vector<2x1xf32> to vector<2x32xf32>
    %187 = arith.subf %172, %186 : vector<2x32xf32>
    %cst_77 = arith.constant 9.99999974E-6 : f32
    %188 = vector.broadcast %cst_77 : f32 to vector<2x1xf32>
    %189 = arith.addf %185, %188 : vector<2x1xf32>
    %190 = math.rsqrt %189 : vector<2x1xf32>
    %191 = vector.broadcast %190 : vector<2x1xf32> to vector<2x32xf32>
    %192 = arith.mulf %187, %191 : vector<2x32xf32>
    %193 = vector.broadcast %173 : vector<1x32xf32> to vector<2x32xf32>
    %194 = arith.mulf %192, %193 : vector<2x32xf32>
    %195 = vector.broadcast %174 : vector<1x32xf32> to vector<2x32xf32>
    %196 = arith.addf %194, %195 : vector<2x32xf32>
    %c0_78 = arith.constant 0 : index
    %c0_79 = arith.constant 0 : index
    %c0_80 = arith.constant 0 : index
    %197 = vector.load %arg11[%c0_78, %c0_79, %c0_80] : memref<2x4x32xf32, #tpu.memory_space<vmem>>, vector<2x4x32xf32>
    %c0_81 = arith.constant 0 : index
    %c0_82 = arith.constant 0 : index
    %c0_83 = arith.constant 0 : index
    %198 = vector.load %arg12[%c0_81, %c0_82, %c0_83] : memref<2x4x32xf32, #tpu.memory_space<vmem>>, vector<2x4x32xf32>
    %c0_84 = arith.constant 0 : index
    %c0_85 = arith.constant 0 : index
    %c0_86 = arith.constant 0 : index
    %199 = vector.load %arg13[%c0_84, %c0_85, %c0_86] : memref<2x4x32xf32, #tpu.memory_space<vmem>>, vector<2x4x32xf32>
    %c0_87 = arith.constant 0 : index
    %c0_88 = arith.constant 0 : index
    %200 = vector.load %arg17[%c0_87, %c0_88] : memref<96x32xf32, #tpu.memory_space<vmem>>, vector<32x32xf32>
    %c16 = arith.constant 16 : index
    %c0_89 = arith.constant 0 : index
    %201 = vector.load %arg19[%c16, %c0_89] : memref<17x128xf32, #tpu.memory_space<vmem>>, vector<1x32xf32>
    %202 = vector.extract_strided_slice %197 {offsets = [0, 0, 0], sizes = [1, 4, 32], strides = [1, 1, 1]} : vector<2x4x32xf32> to vector<1x4x32xf32>
    %203 = vector.shape_cast %202 : vector<1x4x32xf32> to vector<4x32xf32>
    %204 = vector.extract_strided_slice %197 {offsets = [1, 0, 0], sizes = [1, 4, 32], strides = [1, 1, 1]} : vector<2x4x32xf32> to vector<1x4x32xf32>
    %205 = vector.shape_cast %204 : vector<1x4x32xf32> to vector<4x32xf32>
    %206 = tpu.concatenate %203, %205, %106 in 0 : vector<4x32xf32>, vector<4x32xf32>, vector<2x32xf32> -> vector<10x32xf32>
    %cst_90 = arith.constant dense<0.000000e+00> : vector<10x32xf32>
    %207 = tpu.matmul %206, %200, %cst_90 {dimension_numbers = #tpu.dot_dimension_numbers<[1], [0], [0], [1], [0, 0, 1, 1], [], []>} : vector<10x32xf32>, vector<32x32xf32>, vector<10x32xf32> -> vector<10x32xf32>
    %208 = vector.broadcast %201 : vector<1x32xf32> to vector<10x32xf32>
    %209 = arith.addf %207, %208 : vector<10x32xf32>
    %210 = vector.extract_strided_slice %209 {offsets = [0, 0], sizes = [4, 32], strides = [1, 1]} : vector<10x32xf32> to vector<4x32xf32>
    %211 = vector.shape_cast %210 : vector<4x32xf32> to vector<1x4x32xf32>
    %212 = vector.extract_strided_slice %209 {offsets = [4, 0], sizes = [4, 32], strides = [1, 1]} : vector<10x32xf32> to vector<4x32xf32>
    %213 = vector.shape_cast %212 : vector<4x32xf32> to vector<1x4x32xf32>
    %214 = tpu.concatenate %211, %213 in 0 : vector<1x4x32xf32>, vector<1x4x32xf32> -> vector<2x4x32xf32>
    %215 = vector.extract_strided_slice %209 {offsets = [8, 0], sizes = [2, 32], strides = [1, 1]} : vector<10x32xf32> to vector<2x32xf32>
    %c32_91 = arith.constant 32 : index
    %c0_92 = arith.constant 0 : index
    %216 = vector.load %arg17[%c32_91, %c0_92] : memref<96x32xf32, #tpu.memory_space<vmem>>, vector<32x32xf32>
    %c16_93 = arith.constant 16 : index
    %c32_94 = arith.constant 32 : index
    %217 = vector.load %arg19[%c16_93, %c32_94] : memref<17x128xf32, #tpu.memory_space<vmem>>, vector<1x32xf32>
    %218 = vector.extract_strided_slice %198 {offsets = [0, 0, 0], sizes = [1, 4, 32], strides = [1, 1, 1]} : vector<2x4x32xf32> to vector<1x4x32xf32>
    %219 = vector.shape_cast %218 : vector<1x4x32xf32> to vector<4x32xf32>
    %220 = vector.extract_strided_slice %198 {offsets = [1, 0, 0], sizes = [1, 4, 32], strides = [1, 1, 1]} : vector<2x4x32xf32> to vector<1x4x32xf32>
    %221 = vector.shape_cast %220 : vector<1x4x32xf32> to vector<4x32xf32>
    %222 = tpu.concatenate %219, %221, %134 in 0 : vector<4x32xf32>, vector<4x32xf32>, vector<2x32xf32> -> vector<10x32xf32>
    %cst_95 = arith.constant dense<0.000000e+00> : vector<10x32xf32>
    %223 = tpu.matmul %222, %216, %cst_95 {dimension_numbers = #tpu.dot_dimension_numbers<[1], [0], [0], [1], [0, 0, 1, 1], [], []>} : vector<10x32xf32>, vector<32x32xf32>, vector<10x32xf32> -> vector<10x32xf32>
    %224 = vector.broadcast %217 : vector<1x32xf32> to vector<10x32xf32>
    %225 = arith.addf %223, %224 : vector<10x32xf32>
    %226 = vector.extract_strided_slice %225 {offsets = [0, 0], sizes = [4, 32], strides = [1, 1]} : vector<10x32xf32> to vector<4x32xf32>
    %227 = vector.shape_cast %226 : vector<4x32xf32> to vector<1x4x32xf32>
    %228 = vector.extract_strided_slice %225 {offsets = [4, 0], sizes = [4, 32], strides = [1, 1]} : vector<10x32xf32> to vector<4x32xf32>
    %229 = vector.shape_cast %228 : vector<4x32xf32> to vector<1x4x32xf32>
    %230 = tpu.concatenate %227, %229 in 0 : vector<1x4x32xf32>, vector<1x4x32xf32> -> vector<2x4x32xf32>
    %231 = vector.extract_strided_slice %225 {offsets = [8, 0], sizes = [2, 32], strides = [1, 1]} : vector<10x32xf32> to vector<2x32xf32>
    %c64 = arith.constant 64 : index
    %c0_96 = arith.constant 0 : index
    %232 = vector.load %arg17[%c64, %c0_96] : memref<96x32xf32, #tpu.memory_space<vmem>>, vector<32x32xf32>
    %c16_97 = arith.constant 16 : index
    %c64_98 = arith.constant 64 : index
    %233 = vector.load %arg19[%c16_97, %c64_98] : memref<17x128xf32, #tpu.memory_space<vmem>>, vector<1x32xf32>
    %234 = vector.extract_strided_slice %199 {offsets = [0, 0, 0], sizes = [1, 4, 32], strides = [1, 1, 1]} : vector<2x4x32xf32> to vector<1x4x32xf32>
    %235 = vector.shape_cast %234 : vector<1x4x32xf32> to vector<4x32xf32>
    %236 = vector.extract_strided_slice %199 {offsets = [1, 0, 0], sizes = [1, 4, 32], strides = [1, 1, 1]} : vector<2x4x32xf32> to vector<1x4x32xf32>
    %237 = vector.shape_cast %236 : vector<1x4x32xf32> to vector<4x32xf32>
    %238 = tpu.concatenate %235, %237, %73 in 0 : vector<4x32xf32>, vector<4x32xf32>, vector<2x32xf32> -> vector<10x32xf32>
    %cst_99 = arith.constant dense<0.000000e+00> : vector<10x32xf32>
    %239 = tpu.matmul %238, %232, %cst_99 {dimension_numbers = #tpu.dot_dimension_numbers<[1], [0], [0], [1], [0, 0, 1, 1], [], []>} : vector<10x32xf32>, vector<32x32xf32>, vector<10x32xf32> -> vector<10x32xf32>
    %240 = vector.broadcast %233 : vector<1x32xf32> to vector<10x32xf32>
    %241 = arith.addf %239, %240 : vector<10x32xf32>
    %242 = vector.extract_strided_slice %241 {offsets = [0, 0], sizes = [4, 32], strides = [1, 1]} : vector<10x32xf32> to vector<4x32xf32>
    %243 = vector.shape_cast %242 : vector<4x32xf32> to vector<1x4x32xf32>
    %244 = vector.extract_strided_slice %241 {offsets = [4, 0], sizes = [4, 32], strides = [1, 1]} : vector<10x32xf32> to vector<4x32xf32>
    %245 = vector.shape_cast %244 : vector<4x32xf32> to vector<1x4x32xf32>
    %246 = tpu.concatenate %243, %245 in 0 : vector<1x4x32xf32>, vector<1x4x32xf32> -> vector<2x4x32xf32>
    %247 = vector.extract_strided_slice %241 {offsets = [8, 0], sizes = [2, 32], strides = [1, 1]} : vector<10x32xf32> to vector<2x32xf32>
    %c0_100 = arith.constant 0 : index
    %c0_101 = arith.constant 0 : index
    %248 = vector.load %arg16[%c0_100, %c0_101] : memref<32x96xf32, #tpu.memory_space<vmem>>, vector<32x96xf32>
    %cst_102 = arith.constant dense<0.000000e+00> : vector<2x96xf32>
    %249 = tpu.matmul %196, %248, %cst_102 {dimension_numbers = #tpu.dot_dimension_numbers<[1], [0], [0], [1], [0, 0, 1, 1], [], []>} : vector<2x32xf32>, vector<32x96xf32>, vector<2x96xf32> -> vector<2x96xf32>
    %c10 = arith.constant 10 : index
    %c0_103 = arith.constant 0 : index
    %250 = vector.load %arg19[%c10, %c0_103] : memref<17x128xf32, #tpu.memory_space<vmem>>, vector<1x96xf32>
    %251 = vector.broadcast %250 : vector<1x96xf32> to vector<2x96xf32>
    %252 = arith.addf %249, %251 : vector<2x96xf32>
    %253 = vector.extract_strided_slice %252 {offsets = [0, 0], sizes = [2, 32], strides = [1, 1]} : vector<2x96xf32> to vector<2x32xf32>
    %c13 = arith.constant 13 : index
    %c0_104 = arith.constant 0 : index
    %254 = vector.load %arg19[%c13, %c0_104] : memref<17x128xf32, #tpu.memory_space<vmem>>, vector<1x32xf32>
    %c13_105 = arith.constant 13 : index
    %c32_106 = arith.constant 32 : index
    %255 = vector.load %arg19[%c13_105, %c32_106] : memref<17x128xf32, #tpu.memory_space<vmem>>, vector<1x1xf32>
    %256 = vector.shape_cast %253 : vector<2x32xf32> to vector<2x1x32xf32>
    %257 = vector.broadcast %256 : vector<2x1x32xf32> to vector<2x4x32xf32>
    %258 = arith.addf %214, %257 : vector<2x4x32xf32>
    %259 = math.tanh %258 : vector<2x4x32xf32>
    %260 = vector.shape_cast %254 : vector<1x32xf32> to vector<1x1x32xf32>
    %261 = vector.broadcast %260 : vector<1x1x32xf32> to vector<2x4x32xf32>
    %262 = arith.mulf %259, %261 : vector<2x4x32xf32>
    %cst_107 = arith.constant dense<0.000000e+00> : vector<2x4xf32>
    %263 = vector.multi_reduction <add>, %262, %cst_107 [2] : vector<2x4x32xf32> to vector<2x4xf32>
    %264 = vector.broadcast %255 : vector<1x1xf32> to vector<2x4xf32>
    %265 = arith.addf %263, %264 : vector<2x4xf32>
    %266 = arith.addf %215, %253 : vector<2x32xf32>
    %267 = math.tanh %266 : vector<2x32xf32>
    %268 = vector.broadcast %254 : vector<1x32xf32> to vector<2x32xf32>
    %269 = arith.mulf %267, %268 : vector<2x32xf32>
    %cst_108 = arith.constant dense<0.000000e+00> : vector<2xf32>
    %270 = vector.multi_reduction <add>, %269, %cst_108 [1] : vector<2x32xf32> to vector<2xf32>
    %271 = vector.shape_cast %270 : vector<2xf32> to vector<2x1xf32>
    %272 = vector.broadcast %255 : vector<1x1xf32> to vector<2x1xf32>
    %273 = arith.addf %271, %272 : vector<2x1xf32>
    %cst_109 = arith.constant dense<0xFF800000> : vector<2xf32>
    %274 = vector.multi_reduction <maximumf>, %265, %cst_109 [1] : vector<2x4xf32> to vector<2xf32>
    %275 = vector.shape_cast %274 : vector<2xf32> to vector<2x1xf32>
    %276 = arith.maximumf %275, %273 : vector<2x1xf32>
    %277 = vector.broadcast %276 : vector<2x1xf32> to vector<2x4xf32>
    %278 = arith.subf %265, %277 : vector<2x4xf32>
    %279 = math.exp %278 : vector<2x4xf32>
    %280 = arith.subf %273, %276 : vector<2x1xf32>
    %281 = math.exp %280 : vector<2x1xf32>
    %cst_110 = arith.constant dense<0.000000e+00> : vector<2xf32>
    %282 = vector.multi_reduction <add>, %279, %cst_110 [1] : vector<2x4xf32> to vector<2xf32>
    %283 = vector.shape_cast %282 : vector<2xf32> to vector<2x1xf32>
    %284 = arith.addf %283, %281 : vector<2x1xf32>
    %285 = vector.shape_cast %279 : vector<2x4xf32> to vector<2x4x1xf32>
    %286 = vector.broadcast %285 : vector<2x4x1xf32> to vector<2x4x32xf32>
    %287 = arith.mulf %286, %197 : vector<2x4x32xf32>
    %cst_111 = arith.constant dense<0.000000e+00> : vector<2x32xf32>
    %288 = vector.multi_reduction <add>, %287, %cst_111 [1] : vector<2x4x32xf32> to vector<2x32xf32>
    %289 = vector.broadcast %281 : vector<2x1xf32> to vector<2x32xf32>
    %290 = arith.mulf %289, %106 : vector<2x32xf32>
    %291 = arith.addf %288, %290 : vector<2x32xf32>
    %292 = vector.broadcast %284 : vector<2x1xf32> to vector<2x32xf32>
    %293 = arith.divf %291, %292 : vector<2x32xf32>
    %294 = vector.extract_strided_slice %252 {offsets = [0, 32], sizes = [2, 32], strides = [1, 1]} : vector<2x96xf32> to vector<2x32xf32>
    %c14 = arith.constant 14 : index
    %c0_112 = arith.constant 0 : index
    %295 = vector.load %arg19[%c14, %c0_112] : memref<17x128xf32, #tpu.memory_space<vmem>>, vector<1x32xf32>
    %c14_113 = arith.constant 14 : index
    %c32_114 = arith.constant 32 : index
    %296 = vector.load %arg19[%c14_113, %c32_114] : memref<17x128xf32, #tpu.memory_space<vmem>>, vector<1x1xf32>
    %297 = vector.shape_cast %294 : vector<2x32xf32> to vector<2x1x32xf32>
    %298 = vector.broadcast %297 : vector<2x1x32xf32> to vector<2x4x32xf32>
    %299 = arith.addf %230, %298 : vector<2x4x32xf32>
    %300 = math.tanh %299 : vector<2x4x32xf32>
    %301 = vector.shape_cast %295 : vector<1x32xf32> to vector<1x1x32xf32>
    %302 = vector.broadcast %301 : vector<1x1x32xf32> to vector<2x4x32xf32>
    %303 = arith.mulf %300, %302 : vector<2x4x32xf32>
    %cst_115 = arith.constant dense<0.000000e+00> : vector<2x4xf32>
    %304 = vector.multi_reduction <add>, %303, %cst_115 [2] : vector<2x4x32xf32> to vector<2x4xf32>
    %305 = vector.broadcast %296 : vector<1x1xf32> to vector<2x4xf32>
    %306 = arith.addf %304, %305 : vector<2x4xf32>
    %307 = arith.addf %231, %294 : vector<2x32xf32>
    %308 = math.tanh %307 : vector<2x32xf32>
    %309 = vector.broadcast %295 : vector<1x32xf32> to vector<2x32xf32>
    %310 = arith.mulf %308, %309 : vector<2x32xf32>
    %cst_116 = arith.constant dense<0.000000e+00> : vector<2xf32>
    %311 = vector.multi_reduction <add>, %310, %cst_116 [1] : vector<2x32xf32> to vector<2xf32>
    %312 = vector.shape_cast %311 : vector<2xf32> to vector<2x1xf32>
    %313 = vector.broadcast %296 : vector<1x1xf32> to vector<2x1xf32>
    %314 = arith.addf %312, %313 : vector<2x1xf32>
    %cst_117 = arith.constant dense<0xFF800000> : vector<2xf32>
    %315 = vector.multi_reduction <maximumf>, %306, %cst_117 [1] : vector<2x4xf32> to vector<2xf32>
    %316 = vector.shape_cast %315 : vector<2xf32> to vector<2x1xf32>
    %317 = arith.maximumf %316, %314 : vector<2x1xf32>
    %318 = vector.broadcast %317 : vector<2x1xf32> to vector<2x4xf32>
    %319 = arith.subf %306, %318 : vector<2x4xf32>
    %320 = math.exp %319 : vector<2x4xf32>
    %321 = arith.subf %314, %317 : vector<2x1xf32>
    %322 = math.exp %321 : vector<2x1xf32>
    %cst_118 = arith.constant dense<0.000000e+00> : vector<2xf32>
    %323 = vector.multi_reduction <add>, %320, %cst_118 [1] : vector<2x4xf32> to vector<2xf32>
    %324 = vector.shape_cast %323 : vector<2xf32> to vector<2x1xf32>
    %325 = arith.addf %324, %322 : vector<2x1xf32>
    %326 = vector.shape_cast %320 : vector<2x4xf32> to vector<2x4x1xf32>
    %327 = vector.broadcast %326 : vector<2x4x1xf32> to vector<2x4x32xf32>
    %328 = arith.mulf %327, %198 : vector<2x4x32xf32>
    %cst_119 = arith.constant dense<0.000000e+00> : vector<2x32xf32>
    %329 = vector.multi_reduction <add>, %328, %cst_119 [1] : vector<2x4x32xf32> to vector<2x32xf32>
    %330 = vector.broadcast %322 : vector<2x1xf32> to vector<2x32xf32>
    %331 = arith.mulf %330, %134 : vector<2x32xf32>
    %332 = arith.addf %329, %331 : vector<2x32xf32>
    %333 = vector.broadcast %325 : vector<2x1xf32> to vector<2x32xf32>
    %334 = arith.divf %332, %333 : vector<2x32xf32>
    %335 = vector.extract_strided_slice %252 {offsets = [0, 64], sizes = [2, 32], strides = [1, 1]} : vector<2x96xf32> to vector<2x32xf32>
    %c15 = arith.constant 15 : index
    %c0_120 = arith.constant 0 : index
    %336 = vector.load %arg19[%c15, %c0_120] : memref<17x128xf32, #tpu.memory_space<vmem>>, vector<1x32xf32>
    %c15_121 = arith.constant 15 : index
    %c32_122 = arith.constant 32 : index
    %337 = vector.load %arg19[%c15_121, %c32_122] : memref<17x128xf32, #tpu.memory_space<vmem>>, vector<1x1xf32>
    %338 = vector.shape_cast %335 : vector<2x32xf32> to vector<2x1x32xf32>
    %339 = vector.broadcast %338 : vector<2x1x32xf32> to vector<2x4x32xf32>
    %340 = arith.addf %246, %339 : vector<2x4x32xf32>
    %341 = math.tanh %340 : vector<2x4x32xf32>
    %342 = vector.shape_cast %336 : vector<1x32xf32> to vector<1x1x32xf32>
    %343 = vector.broadcast %342 : vector<1x1x32xf32> to vector<2x4x32xf32>
    %344 = arith.mulf %341, %343 : vector<2x4x32xf32>
    %cst_123 = arith.constant dense<0.000000e+00> : vector<2x4xf32>
    %345 = vector.multi_reduction <add>, %344, %cst_123 [2] : vector<2x4x32xf32> to vector<2x4xf32>
    %346 = vector.broadcast %337 : vector<1x1xf32> to vector<2x4xf32>
    %347 = arith.addf %345, %346 : vector<2x4xf32>
    %348 = arith.addf %247, %335 : vector<2x32xf32>
    %349 = math.tanh %348 : vector<2x32xf32>
    %350 = vector.broadcast %336 : vector<1x32xf32> to vector<2x32xf32>
    %351 = arith.mulf %349, %350 : vector<2x32xf32>
    %cst_124 = arith.constant dense<0.000000e+00> : vector<2xf32>
    %352 = vector.multi_reduction <add>, %351, %cst_124 [1] : vector<2x32xf32> to vector<2xf32>
    %353 = vector.shape_cast %352 : vector<2xf32> to vector<2x1xf32>
    %354 = vector.broadcast %337 : vector<1x1xf32> to vector<2x1xf32>
    %355 = arith.addf %353, %354 : vector<2x1xf32>
    %cst_125 = arith.constant dense<0xFF800000> : vector<2xf32>
    %356 = vector.multi_reduction <maximumf>, %347, %cst_125 [1] : vector<2x4xf32> to vector<2xf32>
    %357 = vector.shape_cast %356 : vector<2xf32> to vector<2x1xf32>
    %358 = arith.maximumf %357, %355 : vector<2x1xf32>
    %359 = vector.broadcast %358 : vector<2x1xf32> to vector<2x4xf32>
    %360 = arith.subf %347, %359 : vector<2x4xf32>
    %361 = math.exp %360 : vector<2x4xf32>
    %362 = arith.subf %355, %358 : vector<2x1xf32>
    %363 = math.exp %362 : vector<2x1xf32>
    %cst_126 = arith.constant dense<0.000000e+00> : vector<2xf32>
    %364 = vector.multi_reduction <add>, %361, %cst_126 [1] : vector<2x4xf32> to vector<2xf32>
    %365 = vector.shape_cast %364 : vector<2xf32> to vector<2x1xf32>
    %366 = arith.addf %365, %363 : vector<2x1xf32>
    %367 = vector.shape_cast %361 : vector<2x4xf32> to vector<2x4x1xf32>
    %368 = vector.broadcast %367 : vector<2x4x1xf32> to vector<2x4x32xf32>
    %369 = arith.mulf %368, %199 : vector<2x4x32xf32>
    %cst_127 = arith.constant dense<0.000000e+00> : vector<2x32xf32>
    %370 = vector.multi_reduction <add>, %369, %cst_127 [1] : vector<2x4x32xf32> to vector<2x32xf32>
    %371 = vector.broadcast %363 : vector<2x1xf32> to vector<2x32xf32>
    %372 = arith.mulf %371, %73 : vector<2x32xf32>
    %373 = arith.addf %370, %372 : vector<2x32xf32>
    %374 = vector.broadcast %366 : vector<2x1xf32> to vector<2x32xf32>
    %375 = arith.divf %373, %374 : vector<2x32xf32>
    %376 = tpu.concatenate %293, %334, %375, %196 in 1 : vector<2x32xf32>, vector<2x32xf32>, vector<2x32xf32>, vector<2x32xf32> -> vector<2x128xf32>
    %c0_128 = arith.constant 0 : index
    %c0_129 = arith.constant 0 : index
    %377 = vector.load %arg6[%c0_128, %c0_129] : memref<2x32xf32, #tpu.memory_space<vmem>>, vector<2x32xf32>
    %c224 = arith.constant 224 : index
    %c0_130 = arith.constant 0 : index
    %378 = vector.load %arg14[%c224, %c0_130] : memref<448x96xf32, #tpu.memory_space<vmem>>, vector<128x96xf32>
    %cst_131 = arith.constant dense<0.000000e+00> : vector<2x96xf32>
    %379 = tpu.matmul %376, %378, %cst_131 {dimension_numbers = #tpu.dot_dimension_numbers<[1], [0], [0], [1], [0, 0, 1, 1], [], []>} : vector<2x128xf32>, vector<128x96xf32>, vector<2x96xf32> -> vector<2x96xf32>
    %c4 = arith.constant 4 : index
    %c0_132 = arith.constant 0 : index
    %380 = vector.load %arg19[%c4, %c0_132] : memref<17x128xf32, #tpu.memory_space<vmem>>, vector<1x96xf32>
    %381 = vector.broadcast %380 : vector<1x96xf32> to vector<2x96xf32>
    %382 = arith.addf %379, %381 : vector<2x96xf32>
    %c416 = arith.constant 416 : index
    %c0_133 = arith.constant 0 : index
    %383 = vector.load %arg14[%c416, %c0_133] : memref<448x96xf32, #tpu.memory_space<vmem>>, vector<32x96xf32>
    %cst_134 = arith.constant dense<0.000000e+00> : vector<2x96xf32>
    %384 = tpu.matmul %377, %383, %cst_134 {dimension_numbers = #tpu.dot_dimension_numbers<[1], [0], [0], [1], [0, 0, 1, 1], [], []>} : vector<2x32xf32>, vector<32x96xf32>, vector<2x96xf32> -> vector<2x96xf32>
    %c5 = arith.constant 5 : index
    %c0_135 = arith.constant 0 : index
    %385 = vector.load %arg19[%c5, %c0_135] : memref<17x128xf32, #tpu.memory_space<vmem>>, vector<1x96xf32>
    %386 = vector.broadcast %385 : vector<1x96xf32> to vector<2x96xf32>
    %387 = arith.addf %384, %386 : vector<2x96xf32>
    %388 = vector.extract_strided_slice %382 {offsets = [0, 0], sizes = [2, 32], strides = [1, 1]} : vector<2x96xf32> to vector<2x32xf32>
    %389 = vector.extract_strided_slice %387 {offsets = [0, 0], sizes = [2, 32], strides = [1, 1]} : vector<2x96xf32> to vector<2x32xf32>
    %390 = arith.addf %388, %389 : vector<2x32xf32>
    %391 = arith.negf %390 : vector<2x32xf32>
    %392 = math.exp %391 : vector<2x32xf32>
    %cst_136 = arith.constant 1.000000e+00 : f32
    %393 = vector.broadcast %cst_136 : f32 to vector<2x32xf32>
    %394 = arith.addf %393, %392 : vector<2x32xf32>
    %395 = arith.divf %393, %394 : vector<2x32xf32>
    %396 = vector.extract_strided_slice %382 {offsets = [0, 32], sizes = [2, 32], strides = [1, 1]} : vector<2x96xf32> to vector<2x32xf32>
    %397 = vector.extract_strided_slice %387 {offsets = [0, 32], sizes = [2, 32], strides = [1, 1]} : vector<2x96xf32> to vector<2x32xf32>
    %398 = arith.addf %396, %397 : vector<2x32xf32>
    %399 = arith.negf %398 : vector<2x32xf32>
    %400 = math.exp %399 : vector<2x32xf32>
    %cst_137 = arith.constant 1.000000e+00 : f32
    %401 = vector.broadcast %cst_137 : f32 to vector<2x32xf32>
    %402 = arith.addf %401, %400 : vector<2x32xf32>
    %403 = arith.divf %401, %402 : vector<2x32xf32>
    %404 = vector.extract_strided_slice %382 {offsets = [0, 64], sizes = [2, 32], strides = [1, 1]} : vector<2x96xf32> to vector<2x32xf32>
    %405 = vector.extract_strided_slice %387 {offsets = [0, 64], sizes = [2, 32], strides = [1, 1]} : vector<2x96xf32> to vector<2x32xf32>
    %406 = arith.mulf %395, %405 : vector<2x32xf32>
    %407 = arith.addf %404, %406 : vector<2x32xf32>
    %408 = math.tanh %407 : vector<2x32xf32>
    %cst_138 = arith.constant 1.000000e+00 : f32
    %409 = vector.broadcast %cst_138 : f32 to vector<2x32xf32>
    %410 = arith.subf %409, %403 : vector<2x32xf32>
    %411 = arith.mulf %410, %408 : vector<2x32xf32>
    %412 = arith.mulf %403, %377 : vector<2x32xf32>
    %413 = arith.addf %411, %412 : vector<2x32xf32>
    %c8 = arith.constant 8 : index
    %c0_139 = arith.constant 0 : index
    %414 = vector.load %arg19[%c8, %c0_139] : memref<17x128xf32, #tpu.memory_space<vmem>>, vector<1x32xf32>
    %c8_140 = arith.constant 8 : index
    %c32_141 = arith.constant 32 : index
    %415 = vector.load %arg19[%c8_140, %c32_141] : memref<17x128xf32, #tpu.memory_space<vmem>>, vector<1x32xf32>
    %cst_142 = arith.constant dense<0.000000e+00> : vector<2xf32>
    %416 = vector.multi_reduction <add>, %413, %cst_142 [1] : vector<2x32xf32> to vector<2xf32>
    %417 = vector.shape_cast %416 : vector<2xf32> to vector<2x1xf32>
    %cst_143 = arith.constant 3.200000e+01 : f32
    %418 = vector.broadcast %cst_143 : f32 to vector<2x1xf32>
    %419 = arith.divf %417, %418 : vector<2x1xf32>
    %420 = vector.broadcast %419 : vector<2x1xf32> to vector<2x32xf32>
    %421 = arith.subf %413, %420 : vector<2x32xf32>
    %422 = arith.mulf %421, %421 : vector<2x32xf32>
    %cst_144 = arith.constant dense<0.000000e+00> : vector<2xf32>
    %423 = vector.multi_reduction <add>, %422, %cst_144 [1] : vector<2x32xf32> to vector<2xf32>
    %424 = vector.shape_cast %423 : vector<2xf32> to vector<2x1xf32>
    %cst_145 = arith.constant 3.200000e+01 : f32
    %425 = vector.broadcast %cst_145 : f32 to vector<2x1xf32>
    %426 = arith.divf %424, %425 : vector<2x1xf32>
    %427 = vector.broadcast %419 : vector<2x1xf32> to vector<2x32xf32>
    %428 = arith.subf %413, %427 : vector<2x32xf32>
    %cst_146 = arith.constant 9.99999974E-6 : f32
    %429 = vector.broadcast %cst_146 : f32 to vector<2x1xf32>
    %430 = arith.addf %426, %429 : vector<2x1xf32>
    %431 = math.rsqrt %430 : vector<2x1xf32>
    %432 = vector.broadcast %431 : vector<2x1xf32> to vector<2x32xf32>
    %433 = arith.mulf %428, %432 : vector<2x32xf32>
    %434 = vector.broadcast %414 : vector<1x32xf32> to vector<2x32xf32>
    %435 = arith.mulf %433, %434 : vector<2x32xf32>
    %436 = vector.broadcast %415 : vector<1x32xf32> to vector<2x32xf32>
    %437 = arith.addf %435, %436 : vector<2x32xf32>
    %438 = tpu.concatenate %73, %196, %437 in 1 : vector<2x32xf32>, vector<2x32xf32>, vector<2x32xf32> -> vector<2x96xf32>
    %c0_147 = arith.constant 0 : index
    %c0_148 = arith.constant 0 : index
    %439 = vector.load %arg18[%c0_147, %c0_148] : memref<97x384xf32, #tpu.memory_space<vmem>>, vector<96x384xf32>
    %cst_149 = arith.constant dense<0.000000e+00> : vector<2x384xf32>
    %440 = tpu.matmul %438, %439, %cst_149 {dimension_numbers = #tpu.dot_dimension_numbers<[1], [0], [0], [1], [0, 0, 1, 1], [], []>} : vector<2x96xf32>, vector<96x384xf32>, vector<2x384xf32> -> vector<2x384xf32>
    %c96 = arith.constant 96 : index
    %c0_150 = arith.constant 0 : index
    %441 = vector.load %arg18[%c96, %c0_150] : memref<97x384xf32, #tpu.memory_space<vmem>>, vector<1x384xf32>
    %442 = vector.broadcast %441 : vector<1x384xf32> to vector<2x384xf32>
    %443 = arith.addf %440, %442 : vector<2x384xf32>
    %cst_151 = arith.constant 0.000000e+00 : f32
    %444 = vector.broadcast %cst_151 : f32 to vector<2x96xf32>
    %445 = tpu.concatenate %443, %73, %196, %437, %106, %134, %444 in 1 : vector<2x384xf32>, vector<2x32xf32>, vector<2x32xf32>, vector<2x32xf32>, vector<2x32xf32>, vector<2x32xf32>, vector<2x96xf32> -> vector<2x640xf32>
    %c0_152 = arith.constant 0 : index
    %c0_153 = arith.constant 0 : index
    %446 = vector.load %arg20[%c0_152, %c0_153] : memref<2x640xf32, #tpu.memory_space<vmem>>, vector<2x640xf32>
    tpu.vector_store %arg20[%c0_152, %c0_153], %445 {strides = array<i32>} : memref<2x640xf32, #tpu.memory_space<vmem>>, vector<2x640xf32>,
    return
  }
}

</mosaic_0001>

<bundles_post_ra>
// kernel: core_forward.1
= control target key start
LH: loop header
LB: loop body
LE: loop exit
PB: predicated region body
PF: predicated region fallthrough
CT: control target
= control target key end

     0   :  { %s2761_s0 = inlined_call_operand.vmem [shape: s32[2], index: 0, kind: input, shape index: {}]   ;;  %s2762_s1 = inlined_call_operand.vmem [shape: f32[50,32], index: 1, kind: input, shape index: {}]   ;;  %s2763_s2 = inlined_call_operand.vmem [shape: f32[2,32], index: 2, kind: input, shape index: {}]   ;;  %s2764_s3 = inlined_call_operand.vmem [shape: f32[2,32], index: 3, kind: input, shape index: {}]   ;;  %s2765_s4 = inlined_call_operand.vmem [shape: f32[2,32], index: 4, kind: input, shape index: {}]   ;;  %s2766_s5 = inlined_call_operand.vmem [shape: f32[2,32], index: 5, kind: input, shape index: {}]   ;;  %s2767_s6 = inlined_call_operand.vmem [shape: f32[2,32], index: 6, kind: input, shape index: {}]   ;;  %s2768_s7 = inlined_call_operand.vmem [shape: f32[2,8,32], index: 7, kind: input, shape index: {}]   ;;  %s2769_s8 = inlined_call_operand.vmem [shape: f32[2,8,32], index: 8, kind: input, shape index: {}]   ;;  %s2770_s9 = inlined_call_operand.vmem [shape: f32[2,8,32], index: 9, kind: input, shape index: {}]   ;;  %s2771_s10 = inlined_call_operand.vmem [shape: f32[2,8,32], index: 10, kind: input, shape index: {}]   ;;  %s2772_s11 = inlined_call_operand.vmem [shape: f32[2,4,32], index: 11, kind: input, shape index: {}]   ;;  %s2773_s12 = inlined_call_operand.vmem [shape: f32[2,4,32], index: 12, kind: input, shape index: {}]   ;;  %s2774_s13 = inlined_call_operand.vmem [shape: f32[2,4,32], index: 13, kind: input, shape index: {}]   ;;  %s2775_s14 = inlined_call_operand.vmem [shape: f32[448,96], index: 14, kind: input, shape index: {}]   ;;  %s2776_s15 = inlined_call_operand.vmem [shape: f32[32,64], index: 15, kind: input, shape index: {}]   ;;  %s2777_s16 = inlined_call_operand.vmem [shape: f32[32,96], index: 16, kind: input, shape index: {}]   ;;  %s2778_s17 = inlined_call_operand.vmem [shape: f32[96,32], index: 17, kind: input, shape index: {}]   ;;  %s2779_s18 = inlined_call_operand.vmem [shape: f32[97,384], index: 18, kind: input, shape index: {}]   ;;  %s2780_s19 = inlined_call_operand.vmem [shape: f32[17,128], index: 19, kind: input, shape index: {}]   ;;  %s2781_s20 = inlined_call_operand.vmem [shape: f32[2,640], index: 20, kind: output, shape index: {}]  }
   0x1   :  { %2785 = sst [smem:[#allocation5_spill]] %s2761_s0 }
   0x2   :  { %2786 = sst [smem:[#allocation6_spill]] %s2762_s1 }
   0x3   :  { %2787 = sst [smem:[#allocation7_spill]] %s2763_s2 }
   0x4   :  { %2788 = sst [smem:[#allocation8_spill]] %s2764_s3 }
   0x5   :  { %2789 = sst [smem:[#allocation9_spill]] %s2765_s4 }
   0x6   :  { %25 = vsyncpa [#allocation3], 0  ;;  %s2790_s23 = sld [smem:[#allocation5_spill]]  ;;  %s1829_s2 = smov [#allocation2]  }
   0xc   :  { %s31_s24 = sshll.u32 %s2790_s23, 4  ;;  %s32_s24 = int_to_ptr.vmem [resolvable:$true] %s31_s24 }
   0xd   :  { %34 = dma.vmem_to_smem %s32_s24, 16, %s1829_s2, [#allocation3]  }
   0xe   :  { %1827 = dma.done.wait [#allocation3], 16  }
   0xf   :  { %1828 = vsyncadd [#allocation3], 4294967280 }
  0x10   :  { %77 = sfence }
  0x11   :  { %s2791_s26 = sld [smem:[#allocation7_spill]]  ;;  %s2783_s27 = smov 32   ;;  %v92_v1 = vld [vmem:[%s2767_s6] sm:$0x3]  ;;  %v153_v2 = vld [vmem:[%s2775_s14 + $0x178] sm:$0xff]  ;;  %v152_v3 = vld [vmem:[%s2775_s14 + $0x170] sm:$0xff] }
  0x12   :  { %s1831_s1 = smov 96   ;;  %171 = vmatpush.msra.mxu1 %v153_v2  ;;  %v151_v4 = vld [vmem:[%s2775_s14 + $0x168] sm:$0xff]  ;;  %v127_v5 = vld [vmem:[%s2775_s14 + $0x78] sm:$0xff]  ;;  %v126_v6 = vld [vmem:[%s2775_s14 + $0x70] sm:$0xff]  ;;  %s2792_s4 = sld [smem:[#allocation8_spill]]  ;;  %vm105_vm0 = vcmask 261120  }
  0x13   :  { %102 = vrot.lane.b32.xlu1 %v92_v1, %s1831_s1  ;;  %130 = vmatpush.msra.mxu0 %v127_v5  ;;  %v150_v8 = vld [vmem:[%s2775_s14 + $0x160] sm:$0xff]  ;;  %v125_v9 = vld [vmem:[%s2775_s14 + $0x68] sm:$0xff]  ;;  %s2793_s24 = sld [smem:[#allocation9_spill]]  ;;  %v123_v12 = vld [vmem:[%s2775_s14 + $0x58] sm:$0xff]  ;;  %s1832_s28 = smov 64   ;;  %vm87_vm1 = vcmask 1040384  }
  0x14   :  { %172 = vmatpush.msra.mxu1 %v152_v3  ;;  %v124_v11 = vld [vmem:[%s2775_s14 + $0x60] sm:$0xff]  ;;  %v122_v13 = vld [vmem:[%s2775_s14 + $0x50] sm:$0xff]  ;;  %v121_v14 = vld [vmem:[%s2775_s14 + $0x48] sm:$0xff]  ;;  %s1643_s3 = sld [smem:[#allocation2 + $0x1]]  ;;  %vm107_vm2 = vcmask 523264   ;;  %vm109_vm3 = vcmask 785408  }
  0x15   :  { %131 = vmatpush.msra.mxu0 %v126_v6  ;;  %v120_v15 = vld [vmem:[%s2775_s14 + $0x40] sm:$0xff]  ;;  %v119_v16 = vld [vmem:[%s2775_s14 + $0x38] sm:$0xff]  ;;  %v118_v17 = vld [vmem:[%s2775_s14 + $0x30] sm:$0xff]  ;;  %s2794_s30 = sld [smem:[#allocation6_spill]]  ;;  %vm226_vm8 = vcmask 254976   ;;  %vm336_vm13 = vcmask 1041409  }
  0x16   :  { %173 = vmatpush.msra.mxu1 %v151_v4  ;;  %v117_v18 = vld [vmem:[%s2775_s14 + $0x28] sm:$0xff]  ;;  %v116_v19 = vld [vmem:[%s2775_s14 + $0x20] sm:$0xff]  ;;  %v115_v20 = vld [vmem:[%s2775_s14 + $0x18] sm:$0xff]  ;;  %v1833_v4 = vmov 32.0   ;;  %vm339_vm14 = vcmask 58368  }
  0x17   :  { %v90_v0 = vld [vmem:[%s2791_s26] sm:$0x3]  ;;  %132 = vmatpush.msra.mxu0 %v125_v9  ;;  %v114_v21 = vld [vmem:[%s2775_s14 + $0x10] sm:$0xff]  ;;  %v113_v22 = vld [vmem:[%s2775_s14 + $0x8] sm:$0xff]  ;;  %s78_s26 = sld [smem:[#allocation2]] }
  0x18   :  { %94 = vrot.lane.b32.xlu0 %v90_v0, %s2783_s27  ;;  %v91_v7 = vld [vmem:[%s2792_s4] sm:$0x3]  ;;  %174 = vmatpush.msra.mxu1 %v150_v8 }
  0x19   :  { %v111_v10 = vld [vmem:[%s2793_s24] sm:$0x3]  ;;  %133 = vmatpush.msra.mxu0 %v124_v11 }
  0x1a   :  { %1644 = vmatmul.msk.f32.vlgmr.msra.gmra.mxu1 %vm105_vm0, %v111_v10  ;;  %v112_v23 = vld [vmem:[%s2775_s14] sm:$0xff] }
  0x1b   :  { %134 = vmatpush.msra.mxu0 %v123_v12  ;;  %s82_s0 = scalar_lea.vmem %s2794_s30, %s1643_s3  ;;  %v1697_v35 = vld [vmem:[%s2780_s19 + $0x1] ss:$0 sm:$0xff]  ;;  %v1698_v38 = vld [vmem:[%s2780_s19] ss:$0 sm:$0xff] }
  0x1c   :  { %v83_v24 = vld [vmem:[%s82_s0] sm:$0x1] }
  0x1d   :  { %135 = vmatpush.msra.mxu0 %v122_v13  ;;  %v85_v25 = vrot.slane %v83_v24, 7 }
  0x1f   :  { %136 = vmatpush.msra.mxu0 %v121_v14 }
  0x20   :  { %98 = vrot.lane.b32.xlu0 %v91_v7, %s1832_s28 }
  0x21   :  { %137 = vmatpush.msra.mxu0 %v120_v15  ;;  %v1699_v15 = vld [vmem:[%s2780_s19 + $0x6] ss:$0 sm:$0xff] }
  0x23   :  { %138 = vmatpush.msra.mxu0 %v119_v16 }
  0x25   :  { %139 = vmatpush.msra.mxu0 %v118_v17 }
  0x27   :  { %140 = vmatpush.msra.mxu0 %v117_v18  ;;  %v270_v18 = vld [vmem:[%s2776_s15 + $0x18] sm:$0xff] }
  0x28   :  { %216 = vrot.lane.b32.xlu0 %v111_v10, %s2783_s27  ;;  %s79_s27 = scalar_lea.vmem %s2794_s30, %s78_s26  ;;  %s2795_s26 = smov 32   ;;  %290 = vmatpush.msra.mxu2 %v270_v18 }
  0x29   :  { %141 = vmatpush.msra.mxu0 %v116_v19  ;;  %v80_v26 = vld [vmem:[%s79_s27] sm:$0x1]  ;;  %v269_v19 = vld [vmem:[%s2776_s15 + $0x10] sm:$0xff] }
  0x2a   :  { %v88_v28 = vsel %vm87_vm1, %v80_v26, %v85_v25  ;;  %291 = vmatpush.msra.mxu2 %v269_v19 }
  0x2b   :  { %142 = vmatpush.msra.mxu0 %v115_v20  ;;  %v89_v29 = vmax.f32 %v88_v28, 0.0  ;;  %v268_v20 = vld [vmem:[%s2776_s15 + $0x8] sm:$0xff] }
  0x2c   :  { %292 = vmatpush.msra.mxu2 %v268_v20 }
  0x2d   :  { %143 = vmatpush.msra.mxu0 %v114_v21 }
  0x2f   :  { %144 = vmatpush.msra.mxu0 %v113_v22 }
  0x31   :  { %145 = vmatpush.msra.mxu0 %v112_v23  ;;  %v267_v23 = vld [vmem:[%s2776_s15] sm:$0xff] }
  0x32   :  { %293 = vmatpush.msra.mxu2 %v267_v23 }
  0x85   :  { %v103_v30 = vpop.permute.xlu1 %102 }
  0x8a   :  { %v95_v27 = vpop.permute.xlu0 %94 }
  0x8b   :  { %v106_v31 = vsel %vm105_vm0, %v89_v29, %v95_v27 }
  0x92   :  { %v99_v32 = vpop.permute.xlu0 %98 }
  0x93   :  { %v108_v33 = vsel %vm107_vm2, %v106_v31, %v99_v32 }
  0x94   :  { %v110_v34 = vsel %vm109_vm3, %v108_v33, %v103_v30 }
  0x95   :  { %146 = vmatmul.f32.vlgmr.msra.gmra.mxu0 %v110_v34 }
  0x97   :  { %v176_v36 = vpop.f32.mrf.mxu1 }
  0x98   :  { %v177_v37 = vadd.f32 %v1697_v35, %v176_v36  ;;  %v302_v36 = vld [vmem:[%s2780_s19 + $0xb] sm:$0x1] }
  0x9a   :  { %200 = vrot.lane.b32.xlu1 %v177_v37, %s1832_s28  ;;  %v217_v60 = vpop.permute.xlu0 %216 }
 0x10c   :  { %v201_v52 = vpop.permute.xlu1 %200 }
 0x112   :  { %v147_v39 = vpop.f32.mrf.mxu0 }
 0x113   :  { %v148_v40 = vadd.f32 %v1698_v38, %v147_v39  ;;  %v1701_v39 = vld [vmem:[%s2780_s19 + $0x9] ss:$0 sm:$0xff] }
 0x115   :  { %v179_v41 = vadd.f32 %v177_v37, %v148_v40 }
 0x117   :  { %v1645_v42 = vmul.f32 -1.442695, %v179_v41 }
 0x119   :  { %1714 = vpow2.f32 %v1645_v42  ;;  %v300_v42 = vld [vmem:[%s2769_s8] sm:$0xff] }
 0x11f   :  { %v1715_v43 = vpop.eup %1714 }
 0x120   :  { %v183_v44 = vadd.f32 1.0, %v1715_v43 }
 0x122   :  { %1716 = vrcp.f32 %v183_v44  ;;  %v195_v48 = vand.u32 2147483648, %v183_v44  ;;  %v193_v50 = vand.u32 2147483647, %v183_v44  ;;  %vm189_vm5 = vweird.f32 %v183_v44 }
 0x124   :  { %v196_v53 = vor.u32 1.1754944e-38, %v195_v48  ;;  %vm194_vm7 = vcmp.eq.f32.partialorder %v193_v50, 8.507059e+37 }
 0x128   :  { %v1717_v45 = vpop.eup %1716 }
 0x129   :  { %v185_v46 = vmul.f32 %v1717_v45, %v183_v44  ;;  %vm190_vm4 = vweird.f32 %v1717_v45 }
 0x12a   :  { %vm191_vm6 = vmor %vm189_vm5, %vm190_vm4 }
 0x12b   :  { %v186_v47 = vsub.f32 1.0, %v185_v46 }
 0x12d   :  { %v187_v49 = vmul.f32 %v1717_v45, %v186_v47 }
 0x12f   :  { %v188_v51 = vadd.f32 %v1717_v45, %v187_v49  ;;  %v1700_v49 = vld [vmem:[%s2780_s19 + $0xb] ss:$0 sm:$0xff] }
 0x131   :  { %v192_v54 = vsel %vm191_vm6, %v1717_v45, %v188_v51  ;;  %v301_v45 = vld [vmem:[%s2769_s8 + $0x8] sm:$0xff] }
 0x132   :  { %v197_v55 = vsel %vm194_vm7, %v196_v53, %v192_v54 }
 0x133   :  { %v203_v56 = vmul.f32 %v201_v52, %v197_v55  ;;  %v210_v61 = vsub.f32 1.0, %v197_v55  ;;  %v219_v63 = vmul.f32 %v217_v60, %v197_v55  ;;  %v434_v55 = vld [vmem:[%s2780_s19 + $0xc] sm:$0x1] }
 0x134   :  { %v433_v60 = vld [vmem:[%s2771_s10 + $0x8] sm:$0xff] }
 0x135   :  { %205 = vrot.lane.b32.xlu2 %v203_v56, %s1832_s28  ;;  %v432_v56 = vld [vmem:[%s2771_s10] sm:$0xff] }
 0x18f   :  { %v206_v57 = vpop.permute.xlu2 %205 }
 0x190   :  { %v208_v58 = vadd.f32 %v206_v57, %v148_v40 }
 0x192   :  { %1718 = vtanh.f32 %v208_v58 }
 0x193   :  { %1720 = vrcp.f32 %v1833_v4 }
 0x198   :  { %v1719_v59 = vpop.eup %1718 }
 0x199   :  { %212 = vrot.lane.b32.xlu2 %v1719_v59, %s1831_s1  ;;  %v1721_v5 = vpop.eup %1720  ;;  %v1702_v59 = vld [vmem:[%s2780_s19 + $0xc] ss:$0 sm:$0xff] }
 0x19a   :  { %v231_v6 = vmul.f32 32.0, %v1721_v5  ;;  %vm235_vm9 = vweird.f32 %v1721_v5 }
 0x19c   :  { %v232_v7 = vsub.f32 1.0, %v231_v6 }
 0x19e   :  { %v233_v8 = vmul.f32 %v1721_v5, %v232_v7 }
 0x1a0   :  { %v234_v9 = vadd.f32 %v1721_v5, %v233_v8 }
 0x1a2   :  { %v2041_v10 = vsel %vm235_vm9, %v1721_v5, %v234_v9  ;;  %v332_v9 = vlaneseq }
 0x1f3   :  { %v213_v62 = vpop.permute.xlu2 %212 }
 0x1f4   :  { %v215_v0 = vmul.f32 %v213_v62, %v210_v61 }
 0x1f6   :  { %v220_v1 = vadd.f32 %v219_v63, %v215_v0 }
 0x1f8   :  { %223 = vrot.lane.b32.xlu1 %v220_v1, %s1831_s1 }
 0x26a   :  { %v224_v2 = vpop.permute.xlu1 %223 }
 0x26b   :  { %v227_v3 = vsel %vm226_vm8, %v224_v2, 0.0 }
 0x26c   :  { %228 = vadd.xlane.f32.xlu2 %v227_v3 }
 0x284   :  { %323 = vrot.lane.b32.xlu2 %v302_v36, %s1831_s1 }
 0x2df   :  { %v229_v11 = vpop.xlane.xlu2 %228 }
 0x2e0   :  { %v237_v12 = vmul.f32 %v2041_v10, %v229_v11 }
 0x2e2   :  { %v238_v13 = vsub.f32 %v220_v1, %v237_v12 }
 0x2e4   :  { %v239_v14 = vmul.f32 %v238_v13, %v238_v13 }
 0x2e6   :  { %241 = vrot.lane.b32.xlu0 %v239_v14, %s1831_s1  ;;  %v2106_v14 = vand.u32 127, %v332_v9 }
 0x2e7   :  { %v324_v38 = vpop.permute.xlu2 %323 }
 0x2e8   :  { %1663 = vpush %v324_v38 }
 0x2ee   :  { %262 = vrot.lane.b32.xlu0 %v1699_v15, %s2795_s26 }
 0x319   :  { %s1664_s3 = spop %1663 }
 0x358   :  { %v242_v16 = vpop.permute.xlu0 %241 }
 0x359   :  { %v244_v17 = vsel %vm226_vm8, %v242_v16, 0.0  ;;  %v326_v16 = vstv %s1664_s3 }
 0x35a   :  { %245 = vadd.xlane.f32.xlu1 %v244_v17 }
 0x360   :  { %v263_v32 = vpop.permute.xlu0 %262 }
 0x3cd   :  { %v246_v21 = vpop.xlane.xlu1 %245 }
 0x3ce   :  { %v247_v22 = vmul.f32 %v246_v21, %v2041_v10 }
 0x3d0   :  { %v248_v24 = vadd.f32 1e-05, %v247_v22 }
 0x3d2   :  { %1722 = vrsqrt.f32 %v248_v24  ;;  %vm255_vm11 = vweird.f32 %v248_v24 }
 0x3d8   :  { %v1723_v25 = vpop.eup %1722 }
 0x3d9   :  { %v250_v26 = vmul.f32 %v1723_v25, %v248_v24  ;;  %vm256_vm10 = vweird.f32 %v1723_v25 }
 0x3da   :  { %vm257_vm12 = vmor %vm255_vm11, %vm256_vm10 }
 0x3db   :  { %v251_v27 = vmul.f32 %v1723_v25, %v250_v26 }
 0x3dd   :  { %v252_v28 = vmul.f32 0.5, %v251_v27 }
 0x3df   :  { %v253_v29 = vsub.f32 1.5, %v252_v28  ;;  %v1834_v28 = vmov 0  }
 0x3e0   :  { %1681 = vset.pattern.permute.xlu0 %v1834_v28  ;;  %1680 = vset.pattern.permute.xlu1 %v1834_v28 }
 0x3e1   :  { %v254_v30 = vmul.f32 %v1723_v25, %v253_v29  ;;  %1682 = vset.pattern.permute.xlu2 %v1834_v28 }
 0x3e3   :  { %v258_v31 = vsel %vm257_vm12, %v1723_v25, %v254_v30 }
 0x3e4   :  { %v259_v33 = vmul.f32 %v258_v31, %v238_v13 }
 0x3e6   :  { %v265_v34 = vmul.f32 %v263_v32, %v259_v33 }
 0x3e8   :  { %v2063_v35 = vadd.f32 %v1699_v15, %v265_v34 }
 0x3ea   :  { %274 = vrot.lane.b32.xlu0 %v2063_v35, %s1831_s1 }
 0x45c   :  { %v2071_v37 = vpop.permute.xlu0 %274 }
 0x45d   :  { %1646 = vmatmul.msk.f32.vlgmr.msra.gmra.mxu2 %vm105_vm0, %v2071_v37 }
 0x4e0   :  { %v295_v40 = vpop.f32.mrf.mxu2 }
 0x4e1   :  { %v296_v41 = vadd.f32 %v1701_v39, %v295_v40 }
 0x4e3   :  { %v304_v43 = vrot.slane %v296_v41, 1  ;;  %v305_v44 = vperm.slane %v296_v41, 0 }
 0x4e5   :  { %v306_v46 = vperm.slane %v304_v43, 0  ;;  %v309_v47 = vadd.f32 %v305_v44, %v300_v42  ;;  %435 = vrot.lane.b32.xlu0 %v305_v44, %s1831_s1 }
 0x4e7   :  { %v310_v48 = vadd.f32 %v306_v46, %v301_v45  ;;  %1724 = vtanh.f32 %v309_v47 }
 0x4e9   :  { %1726 = vtanh.f32 %v310_v48 }
 0x4ed   :  { %v1725_v50 = vpop.eup %1724  ;;  %437 = vrot.lane.b32.xlu0 %v306_v46, %s1831_s1 }
 0x4ee   :  { %v314_v51 = vmul.f32 %v1725_v50, %v1700_v49 }
 0x4ef   :  { %v1727_v52 = vpop.eup %1726 }
 0x4f0   :  { %v315_v53 = vmul.f32 %v1727_v52, %v1700_v49  ;;  %v316_v5 = vsel %vm105_vm0, %v314_v51, 0.0 }
 0x4f2   :  { %v319_v54 = vsel %vm105_vm0, %v315_v53, 0.0 }
 0x4f3   :  { %320 = vadd.xlane.f32.xlu2 %v319_v54 }
 0x4f5   :  { %455 = vrot.lane.b32.xlu0 %v434_v55, %s1831_s1 }
 0x557   :  { %v436_v57 = vpop.permute.xlu0 %435 }
 0x558   :  { %v441_v58 = vadd.f32 %v436_v57, %v432_v56 }
 0x55a   :  { %1728 = vtanh.f32 %v441_v58 }
 0x55f   :  { %v438_v61 = vpop.permute.xlu0 %437 }
 0x560   :  { %v1729_v62 = vpop.eup %1728  ;;  %v442_v63 = vadd.f32 %v438_v61, %v433_v60 }
 0x561   :  { %v446_v0 = vmul.f32 %v1729_v62, %v1702_v59 }
 0x562   :  { %1730 = vtanh.f32 %v442_v63 }
 0x563   :  { %v448_v1 = vsel %vm105_vm0, %v446_v0, 0.0 }
 0x564   :  { %449 = vadd.xlane.f32.xlu1 %v448_v1 }
 0x566   :  { %v321_v17 = vpop.xlane.xlu2 %320 }
 0x567   :  { %v456_v2 = vpop.permute.xlu0 %455  ;;  %v329_v21 = vadd.f32 %v326_v16, %v321_v17 }
 0x568   :  { %v1731_v3 = vpop.eup %1730  ;;  %1665 = vpush %v456_v2 }
 0x569   :  { %v447_v4 = vmul.f32 %v1731_v3, %v1702_v59  ;;  %v335_v25 = vperm.slane %v329_v21, %v2106_v14 }
 0x56b   :  { %v451_v6 = vsel %vm105_vm0, %v447_v4, 0.0 }
 0x56c   :  { %317 = vadd.xlane.f32.xlu1 %v316_v5  ;;  %452 = vadd.xlane.f32.xlu0 %v451_v6 }
 0x599   :  { %s1666_s10 = spop %1665 }
 0x59a   :  { %v458_v8 = vstv %s1666_s10 }
 0x5d7   :  { %v450_v7 = vpop.xlane.xlu1 %449 }
 0x5d8   :  { %v460_v11 = vadd.f32 %v458_v8, %v450_v7 }
 0x5da   :  { %v464_v18 = vperm.slane %v460_v11, %v2106_v14 }
 0x5df   :  { %v318_v12 = vpop.xlane.xlu1 %317  ;;  %v453_v13 = vpop.xlane.xlu0 %452 }
 0x5e0   :  { %v461_v15 = vadd.f32 %v458_v8, %v453_v13  ;;  %v328_v19 = vadd.f32 %v326_v16, %v318_v12 }
 0x5e2   :  { %v465_v20 = vperm.slane %v461_v15, %v2106_v14  ;;  %v334_v24 = vperm.slane %v328_v19, %v2106_v14 }
 0x5e4   :  { %v466_v22 = vsel %vm336_vm13, %v465_v20, %v464_v18  ;;  %v337_v26 = vsel %vm336_vm13, %v335_v25, %v334_v24 }
 0x5e5   :  { %v468_v23 = vsel %vm339_vm14, %v466_v22, -inf  ;;  %v340_v27 = vsel %vm339_vm14, %v337_v26, -inf }
 0x5e6   :  { %469 = vmax.xlane.f32.xlu1 %v468_v23 }
 0x5ee   :  { %341 = vmax.xlane.f32.xlu1 %v340_v27 }
 0x659   :  { %v470_v29 = vpop.xlane.xlu1 %469 }
 0x65a   :  { %v472_v30 = vperm.slane %v470_v29, 0  ;;  %v473_v31 = vperm.slane %v470_v29, 1 }
 0x65c   :  { %v476_v32 = vsub.f32 %v460_v11, %v472_v30  ;;  %v477_v33 = vsub.f32 %v461_v15, %v473_v31 }
 0x65e   :  { %v478_v34 = vmul.f32 1.442695, %v476_v32  ;;  %v480_v36 = vmul.f32 1.442695, %v477_v33 }
 0x660   :  { %1732 = vpow2.f32 %v478_v34 }
 0x661   :  { %1734 = vpow2.f32 %v480_v36  ;;  %v342_v38 = vpop.xlane.xlu1 %341 }
 0x662   :  { %v344_v39 = vperm.slane %v342_v38, 0  ;;  %v345_v40 = vperm.slane %v342_v38, 1 }
 0x664   :  { %v348_v41 = vsub.f32 %v328_v19, %v344_v39  ;;  %v349_v42 = vsub.f32 %v329_v21, %v345_v40 }
 0x666   :  { %v1733_v43 = vpop.eup %1732  ;;  %v350_v44 = vmul.f32 1.442695, %v348_v41  ;;  %v352_v45 = vmul.f32 1.442695, %v349_v42 }
 0x667   :  { %v2119_v46 = vpop.eup %1734  ;;  %485 = vperm.xlu1 %1680, %v1733_v43  }
 0x668   :  { %1736 = vpow2.f32 %v350_v44  ;;  %488 = vperm.xlu0 %1681, %v2119_v46  }
 0x669   :  { %1738 = vpow2.f32 %v352_v45 }
 0x66e   :  { %v2122_v47 = vpop.eup %1736 }
 0x66f   :  { %v2124_v48 = vpop.eup %1738  ;;  %357 = vperm.xlu2 %1682, %v2122_v47  }
 0x670   :  { %360 = vperm.xlu1 %1680, %v2124_v48  }
 0x6c9   :  { %v358_v55 = vpop.permute.xlu2 %357 }
 0x6ca   :  { %v362_v57 = vperm.slane %v358_v55, %v2106_v14  ;;  %v613_v55 = vld [vmem:[%s2775_s14 + $0x190] sm:$0xff] }
 0x6d9   :  { %v486_v49 = vpop.permute.xlu1 %485 }
 0x6da   :  { %v489_v50 = vpop.permute.xlu0 %488  ;;  %v490_v51 = vperm.slane %v486_v49, %v2106_v14 }
 0x6db   :  { %v491_v52 = vperm.slane %v489_v50, %v2106_v14 }
 0x6dd   :  { %v492_v53 = vsel %vm336_vm13, %v491_v52, %v490_v51 }
 0x6de   :  { %v494_v54 = vsel %vm339_vm14, %v492_v53, 0.0 }
 0x6df   :  { %495 = vadd.xlane.f32.xlu1 %v494_v54 }
 0x6e2   :  { %v361_v56 = vpop.permute.xlu1 %360 }
 0x6e3   :  { %v363_v58 = vperm.slane %v361_v56, %v2106_v14  ;;  %v2161_v56 = vld [vmem:[%s2766_s5] sm:$0x3] }
 0x6e5   :  { %v364_v59 = vsel %vm336_vm13, %v363_v58, %v362_v57  ;;  %v771_v57 = vld [vmem:[%s2778_s17 + $0x38] sm:$0xff]  ;;  %v770_v58 = vld [vmem:[%s2778_s17 + $0x30] sm:$0xff] }
 0x6e6   :  { %v366_v60 = vsel %vm339_vm14, %v364_v59, 0.0  ;;  %v769_v59 = vld [vmem:[%s2778_s17 + $0x28] sm:$0xff] }
 0x6e7   :  { %367 = vadd.xlane.f32.xlu2 %v366_v60  ;;  %v2177_v60 = vld [vmem:[%s2773_s12 + $0x4] sm:$0xf] }
 0x752   :  { %v496_v61 = vpop.xlane.xlu1 %495 }
 0x753   :  { %v498_v62 = vperm.slane %v496_v61, 0  ;;  %v499_v63 = vperm.slane %v496_v61, 1  ;;  %v773_v61 = vrot.slane %v2177_v60, 4 }
 0x755   :  { %1740 = vrcp.f32 %v498_v62  ;;  %v511_v9 = vand.u32 2147483647, %v498_v62  ;;  %v513_v11 = vand.u32 2147483648, %v498_v62  ;;  %vm507_vm1 = vweird.f32 %v498_v62 }
 0x756   :  { %1742 = vrcp.f32 %v499_v63  ;;  %v528_v24 = vand.u32 2147483648, %v499_v63  ;;  %vm522_vm7 = vweird.f32 %v499_v63  ;;  %v526_v27 = vand.u32 2147483647, %v499_v63 }
 0x757   :  { %vm512_vm5 = vcmp.eq.f32.partialorder %v511_v9, 8.507059e+37  ;;  %v514_v17 = vor.u32 1.1754944e-38, %v513_v11  ;;  %v430_v9 = vld [vmem:[%s2770_s9] sm:$0xff] }
 0x758   :  { %v529_v36 = vor.u32 1.1754944e-38, %v528_v24  ;;  %vm527_vm11 = vcmp.eq.f32.partialorder %v526_v27, 8.507059e+37 }
 0x75a   :  { %v368_v0 = vpop.xlane.xlu2 %367 }
 0x75b   :  { %v1741_v1 = vpop.eup %1740  ;;  %v2136_v2 = vperm.slane %v368_v0, 0  ;;  %v371_v3 = vperm.slane %v368_v0, 1 }
 0x75c   :  { %v1743_v4 = vpop.eup %1742  ;;  %v503_v5 = vmul.f32 %v1741_v1, %v498_v62  ;;  %vm508_vm15 = vweird.f32 %v1741_v1  ;;  %v768_v62 = vld [vmem:[%s2778_s17 + $0x20] sm:$0xff] }
 0x75d   :  { %v518_v6 = vmul.f32 %v1743_v4, %v499_v63  ;;  %1744 = vrcp.f32 %v2136_v2  ;;  %vm509_vm4 = vmor %vm507_vm1, %vm508_vm15  ;;  %vm523_vm6 = vweird.f32 %v1743_v4  ;;  %v400_v30 = vand.u32 2147483648, %v371_v3  ;;  %v2186_v63 = vld [vmem:[%s2773_s12] sm:$0xf] }
 0x75e   :  { %v504_v7 = vsub.f32 1.0, %v503_v5  ;;  %1746 = vrcp.f32 %v371_v3  ;;  %vm524_vm9 = vmor %vm522_vm7, %vm523_vm6  ;;  %v398_v34 = vand.u32 2147483647, %v371_v3  ;;  %vm394_vm12 = vweird.f32 %v371_v3 }
 0x75f   :  { %v519_v8 = vsub.f32 1.0, %v518_v6  ;;  %v401_v40 = vor.u32 1.1754944e-38, %v400_v30  ;;  %v383_v49 = vand.u32 2147483647, %v2136_v2  ;;  %vm734_vm7 = vcmask 1043456   ;;  %v726_v6 = vld [vmem:[%s2778_s17] sm:$0xff] }
 0x760   :  { %v505_v12 = vmul.f32 %v1741_v1, %v504_v7  ;;  %vm399_vm1 = vcmp.eq.f32.partialorder %v398_v34, 8.507059e+37  ;;  %v775_v0 = vsel %vm734_vm7, %v2186_v63, %v773_v61  ;;  %v720_v7 = vld [vmem:[%s2772_s11] sm:$0xf] }
 0x761   :  { %v520_v13 = vmul.f32 %v1743_v4, %v519_v8  ;;  %vm384_vm6 = vcmp.eq.f32.partialorder %v383_v49, 8.507059e+37 }
 0x762   :  { %v506_v15 = vadd.f32 %v1741_v1, %v505_v12 }
 0x763   :  { %v1745_v16 = vpop.eup %1744  ;;  %v521_v21 = vadd.f32 %v1743_v4, %v520_v13  ;;  %v814_v13 = vld [vmem:[%s2778_s17 + $0x58] sm:$0xff] }
 0x764   :  { %v1747_v18 = vpop.eup %1746  ;;  %v375_v19 = vmul.f32 %v1745_v16, %v2136_v2  ;;  %v510_v20 = vsel %vm509_vm4, %v1741_v1, %v506_v15  ;;  %vm380_vm15 = vweird.f32 %v1745_v16  ;;  %vm379_vm4 = vweird.f32 %v2136_v2  ;;  %v729_v1 = vld [vmem:[%s2778_s17 + $0x18] sm:$0xff]  ;;  %v813_v15 = vld [vmem:[%s2778_s17 + $0x50] sm:$0xff] }
 0x765   :  { %v390_v22 = vmul.f32 %v1747_v18, %v371_v3  ;;  %v515_v23 = vsel %vm512_vm5, %v514_v17, %v510_v20  ;;  %v525_v31 = vsel %vm524_vm9, %v1743_v4, %v521_v21  ;;  %vm395_vm10 = vweird.f32 %v1747_v18  ;;  %vm381_vm5 = vmor %vm379_vm4, %vm380_vm15  ;;  %754 = vmatpush.msrb.mxu2 %v729_v1  ;;  %v727_v3 = vld [vmem:[%s2778_s17 + $0x8] sm:$0xff]  ;;  %v721_v4 = vld [vmem:[%s2772_s11 + $0x4] sm:$0xf] }
 0x766   :  { %v376_v25 = vsub.f32 1.0, %v375_v19  ;;  %v516_v26 = vmul.f32 %v1733_v43, %v515_v23  ;;  %v530_v39 = vsel %vm527_vm11, %v529_v36, %v525_v31  ;;  %vm396_vm14 = vmor %vm394_vm12, %vm395_vm10  ;;  %v385_v43 = vand.u32 2147483648, %v2136_v2  ;;  %v728_v2 = vld [vmem:[%s2778_s17 + $0x10] sm:$0xff]  ;;  %v812_v17 = vld [vmem:[%s2778_s17 + $0x48] sm:$0xff] }
 0x767   :  { %v391_v29 = vsub.f32 1.0, %v390_v22  ;;  %v531_v45 = vmul.f32 %v2119_v46, %v530_v39  ;;  %v614_v46 = vld [vmem:[%s2775_s14 + $0x198] sm:$0xff]  ;;  %755 = vmatpush.msrb.mxu2 %v728_v2  ;;  %v732_v5 = vrot.slane %v721_v4, 4  ;;  %v811_v19 = vld [vmem:[%s2778_s17 + $0x40] sm:$0xff]  ;;  %v431_v21 = vld [vmem:[%s2770_s9 + $0x8] sm:$0xff]  ;;  %vm896_vm4 = vcmask 257024  }
 0x768   :  { %534 = vperm.xlu0 %1681, %v516_v26   ;;  %v377_v32 = vmul.f32 %v1745_v16, %v376_v25  ;;  %v386_v52 = vor.u32 1.1754944e-38, %v385_v43  ;;  %632 = vmatpush.msrb.mxu1 %v614_v46  ;;  %v299_v22 = vld [vmem:[%s2768_s7 + $0x8] sm:$0xff]  ;;  %v298_v36 = vld [vmem:[%s2768_s7] sm:$0xff]  ;;  %v584_v43 = vld [vmem:[%s2775_s14 + $0xd0] sm:$0xff] }
 0x769   :  { %v392_v33 = vmul.f32 %v1747_v18, %v391_v29  ;;  %756 = vmatpush.msrb.mxu2 %v727_v3  ;;  %v735_v8 = vsel %vm734_vm7, %v720_v7, %v732_v5  ;;  %v2269_v4 = vld [vmem:[%s2774_s13 + $0x4] sm:$0xf]  ;;  %v2282_v7 = vld [vmem:[%s2774_s13] sm:$0xf] }
 0x76a   :  { %v378_v41 = vadd.f32 %v1745_v16, %v377_v32  ;;  %633 = vmatpush.msrb.mxu1 %v613_v55 }
 0x76b   :  { %v393_v38 = vadd.f32 %v1747_v18, %v392_v33  ;;  %757 = vmatpush.msrb.mxu2 %v726_v6  ;;  %v816_v6 = vrot.slane %v2269_v4, 4 }
 0x76c   :  { %v382_v51 = vsel %vm381_vm5, %v1745_v16, %v378_v41  ;;  %1650 = vmatmul.msk.f32.vlgmr.msrb.gmra.mxu2 %vm105_vm0, %v735_v8  ;;  %vm924_vm5 = vcmask 25600  }
 0x76d   :  { %v397_v42 = vsel %vm396_vm14, %v1747_v18, %v393_v38  ;;  %v387_v53 = vsel %vm384_vm6, %v386_v52, %v382_v51  ;;  %837 = vmatpush.msra.mxu2 %v814_v13  ;;  %v583_v51 = vld [vmem:[%s2775_s14 + $0xc8] sm:$0xff]  ;;  %v818_v8 = vsel %vm734_vm7, %v2282_v7, %v816_v6 }
 0x76e   :  { %v402_v44 = vsel %vm399_vm1, %v401_v40, %v397_v42  ;;  %v388_v54 = vmul.f32 %v2122_v47, %v387_v53  ;;  %v611_v47 = vld [vmem:[%s2775_s14 + $0x180] sm:$0xff]  ;;  %v585_v42 = vld [vmem:[%s2775_s14 + $0xd8] sm:$0xff] }
 0x76f   :  { %v403_v50 = vmul.f32 %v2124_v48, %v402_v44  ;;  %v612_v48 = vld [vmem:[%s2775_s14 + $0x188] sm:$0xff]  ;;  %838 = vmatpush.msra.mxu2 %v813_v15  ;;  %595 = vmatpush.msra.mxu3 %v585_v42 }
 0x770   :  { %539 = vperm.xlu0 %1681, %v531_v45   ;;  %634 = vmatpush.msrb.mxu1 %v612_v48 }
 0x771   :  { %411 = vperm.xlu1 %1680, %v403_v50   ;;  %839 = vmatpush.msra.mxu2 %v812_v17  ;;  %v577_v17 = vld [vmem:[%s2775_s14 + $0x98] sm:$0xff] }
 0x772   :  { %635 = vmatpush.msrb.mxu1 %v611_v47  ;;  %596 = vmatpush.msra.mxu3 %v584_v43 }
 0x773   :  { %1648 = vmatmul.msk.f32.vlgmr.msrb.gmra.mxu1 %vm105_vm0, %v2161_v56  ;;  %840 = vmatpush.msra.mxu2 %v811_v19  ;;  %v575_v19 = vld [vmem:[%s2775_s14 + $0x88] sm:$0xff] }
 0x774   :  { %797 = vmatpush.msra.mxu1 %v771_v57  ;;  %597 = vmatpush.msra.mxu3 %v583_v51  ;;  %v581_v57 = vld [vmem:[%s2775_s14 + $0xb8] sm:$0xff] }
 0x776   :  { %798 = vmatpush.msra.mxu1 %v770_v58 }
 0x778   :  { %406 = vperm.xlu0 %1681, %v388_v54   ;;  %799 = vmatpush.msra.mxu1 %v769_v59  ;;  %v582_v54 = vld [vmem:[%s2775_s14 + $0xc0] sm:$0xff] }
 0x779   :  { %598 = vmatpush.msra.mxu3 %v582_v54 }
 0x77a   :  { %800 = vmatpush.msra.mxu1 %v768_v62 }
 0x77b   :  { %1652 = vmatmul.msk.f32.vlgmr.msra.gmra.mxu1 %vm105_vm0, %v775_v0  ;;  %599 = vmatpush.msra.mxu3 %v581_v57 }
 0x7da   :  { %v535_v11 = vpop.permute.xlu0 %534 }
 0x7db   :  { %v542_v12 = vmul.f32 %v535_v11, %v430_v9  ;;  %v580_v9 = vld [vmem:[%s2775_s14 + $0xb0] sm:$0xff]  ;;  %v579_v11 = vld [vmem:[%s2775_s14 + $0xa8] sm:$0xff] }
 0x7dc   :  { %600 = vmatpush.msra.mxu3 %v580_v9 }
 0x7dd   :  { %v544_v16 = vsel %vm105_vm0, %v542_v12, 0.0  ;;  %v1703_v12 = vld [vmem:[%s2780_s19 + $0x3] ss:$0 sm:$0xff] }
 0x7de   :  { %v545_v18 = vrot.slane %v544_v16, 4  ;;  %601 = vmatpush.msra.mxu3 %v579_v11 }
 0x7e0   :  { %v546_v20 = vadd.f32 %v545_v18, %v544_v16  ;;  %v578_v16 = vld [vmem:[%s2775_s14 + $0xa0] sm:$0xff]  ;;  %v576_v18 = vld [vmem:[%s2775_s14 + $0x90] sm:$0xff] }
 0x7e1   :  { %602 = vmatpush.msra.mxu3 %v578_v16 }
 0x7e2   :  { %v540_v23 = vpop.permute.xlu0 %539  ;;  %v547_v26 = vrot.slane %v546_v20, 2 }
 0x7e3   :  { %v543_v24 = vmul.f32 %v540_v23, %v431_v21  ;;  %v412_v25 = vpop.permute.xlu1 %411  ;;  %603 = vmatpush.msra.mxu3 %v577_v17  ;;  %v852_v17 = vld [vmem:[%s2777_s16 + $0x8] sm:$0xff] }
 0x7e4   :  { %v415_v27 = vmul.f32 %v412_v25, %v299_v22  ;;  %v548_v33 = vadd.f32 %v547_v26, %v546_v20  ;;  %v574_v20 = vld [vmem:[%s2775_s14 + $0x80] sm:$0xff] }
 0x7e5   :  { %v551_v29 = vsel %vm105_vm0, %v543_v24, 0.0  ;;  %604 = vmatpush.msra.mxu3 %v576_v18  ;;  %v1705_v25 = vld [vmem:[%s2780_s19 + $0x2] ss:$0 sm:$0xff] }
 0x7e6   :  { %v552_v30 = vrot.slane %v551_v29, 4  ;;  %v423_v31 = vsel %vm105_vm0, %v415_v27, 0.0  ;;  %v549_v44 = vrot.slane %v548_v33, 1 }
 0x7e7   :  { %v424_v32 = vrot.slane %v423_v31, 4  ;;  %605 = vmatpush.msra.mxu3 %v575_v19  ;;  %v851_v19 = vld [vmem:[%s2777_s16] sm:$0xff] }
 0x7e8   :  { %v553_v34 = vadd.f32 %v552_v30, %v551_v29  ;;  %v550_v46 = vadd.f32 %v549_v44, %v548_v33 }
 0x7e9   :  { %v425_v38 = vadd.f32 %v424_v32, %v423_v31  ;;  %606 = vmatpush.msra.mxu3 %v574_v20 }
 0x7ea   :  { %v554_v39 = vrot.slane %v553_v34, 2  ;;  %v407_v40 = vpop.permute.xlu0 %406 }
 0x7eb   :  { %v414_v41 = vmul.f32 %v407_v40, %v298_v36  ;;  %v426_v49 = vrot.slane %v425_v38, 2 }
 0x7ec   :  { %v555_v45 = vadd.f32 %v554_v39, %v553_v34 }
 0x7ed   :  { %v416_v50 = vsel %vm105_vm0, %v414_v41, 0.0  ;;  %v427_v48 = vadd.f32 %v426_v49, %v425_v38 }
 0x7ee   :  { %v556_v52 = vrot.slane %v555_v45, 1  ;;  %v417_v53 = vrot.slane %v416_v50, 4 }
 0x7ef   :  { %v428_v62 = vrot.slane %v427_v48, 1 }
 0x7f0   :  { %v557_v55 = vadd.f32 %v556_v52, %v555_v45  ;;  %v418_v47 = vadd.f32 %v417_v53, %v416_v50  ;;  %v637_v13 = vpop.f32.mrf.mxu1 }
 0x7f1   :  { %v429_v2 = vadd.f32 %v428_v62, %v427_v48  ;;  %v638_v15 = vadd.f32 %v1703_v12, %v637_v13  ;;  %v854_v13 = vld [vmem:[%s2777_s16 + $0x18] sm:$0xff] }
 0x7f2   :  { %v419_v58 = vrot.slane %v418_v47, 2  ;;  %v2255_v59 = vsel %vm336_vm13, %v557_v55, %v550_v46  ;;  %874 = vmatpush.msrb.mxu3 %v854_v13 }
 0x7f3   :  { %565 = vrot.lane.b32.xlu0 %v2255_v59, %s2795_s26  ;;  %v1620_v61 = vsel %vm105_vm0, %v2255_v59, 0.0  ;;  %1653 = vmatmul.msk.f32.gmra.mxu1 %vm105_vm0, %v2255_v59 }
 0x7f4   :  { %v420_v0 = vadd.f32 %v419_v58, %v418_v47  ;;  %1635 = vst [vmem:[%s2781_s20 + $0x8] sm:$0x3] %v1620_v61  ;;  %661 = vrot.lane.b32.xlu2 %v638_v15, %s1832_s28 }
 0x7f6   :  { %v421_v1 = vrot.slane %v420_v0, 1 }
 0x7f8   :  { %v422_v3 = vadd.f32 %v421_v1, %v420_v0  ;;  %v1706_v1 = vld [vmem:[%s2780_s19 + $0x7] ss:$0 sm:$0xff] }
 0x7fa   :  { %v2272_v5 = vsel %vm336_vm13, %v429_v2, %v422_v3 }
 0x7fb   :  { %568 = vrot.lane.b32.xlu0 %v2063_v35, %s2795_s26  ;;  %1651 = vmatmul.msk.f32.gmra.mxu2 %vm105_vm0, %v2272_v5 }
 0x803   :  { %1654 = vmatmul.msk.f32.vlgmr.msra.gmra.mxu2 %vm105_vm0, %v818_v8 }
 0x80b   :  { %1655 = vmatmul.msk.f32.gmra.mxu2 %vm105_vm0, %v2071_v37 }
 0x84e   :  { %v662_v42 = vpop.permute.xlu2 %661 }
 0x865   :  { %v566_v21 = vpop.permute.xlu0 %565 }
 0x866   :  { %v571_v22 = vsel %vm105_vm0, %v2272_v5, %v566_v21 }
 0x86d   :  { %v569_v23 = vpop.permute.xlu0 %568 }
 0x86e   :  { %v572_v24 = vsel %vm107_vm2, %v571_v22, %v569_v23 }
 0x86f   :  { %1647 = vmatmul.msk.f32.vlgmr.msra.gmra.mxu3 %vm109_vm3, %v572_v24 }
 0x8f2   :  { %v608_v26 = vpop.f32.mrf.mxu3 }
 0x8f3   :  { %v609_v27 = vadd.f32 %v1705_v25, %v608_v26 }
 0x8f5   :  { %v640_v29 = vadd.f32 %v638_v15, %v609_v27  ;;  %v853_v15 = vld [vmem:[%s2777_s16 + $0x10] sm:$0xff] }
 0x8f6   :  { %875 = vmatpush.msrb.mxu3 %v853_v15 }
 0x8f7   :  { %v1649_v30 = vmul.f32 -1.442695, %v640_v29  ;;  %v882_v29 = vld [vmem:[%s2780_s19 + $0xd] sm:$0x1] }
 0x8f8   :  { %876 = vmatpush.msrb.mxu3 %v852_v17 }
 0x8f9   :  { %1748 = vpow2.f32 %v1649_v30  ;;  %v1029_v30 = vld [vmem:[%s2780_s19 + $0xe] sm:$0x1] }
 0x8fa   :  { %877 = vmatpush.msrb.mxu3 %v851_v19 }
 0x8ff   :  { %v1749_v31 = vpop.eup %1748 }
 0x900   :  { %v644_v32 = vadd.f32 1.0, %v1749_v31 }
 0x902   :  { %1750 = vrcp.f32 %v644_v32  ;;  %v656_v38 = vand.u32 2147483648, %v644_v32  ;;  %v654_v40 = vand.u32 2147483647, %v644_v32  ;;  %vm650_vm10 = vweird.f32 %v644_v32 }
 0x904   :  { %v657_v43 = vor.u32 1.1754944e-38, %v656_v38  ;;  %vm655_vm12 = vcmp.eq.f32.partialorder %v654_v40, 8.507059e+37  ;;  %v1178_v40 = vld [vmem:[%s2780_s19 + $0xf] sm:$0x1] }
 0x908   :  { %v1751_v33 = vpop.eup %1750 }
 0x909   :  { %v646_v34 = vmul.f32 %v1751_v33, %v644_v32  ;;  %vm651_vm9 = vweird.f32 %v1751_v33  ;;  %v1709_v32 = vld [vmem:[%s2780_s19 + $0xa] ss:$0 sm:$0xff] }
 0x90a   :  { %vm652_vm11 = vmor %vm650_vm10, %vm651_vm9 }
 0x90b   :  { %v647_v36 = vsub.f32 1.0, %v646_v34 }
 0x90d   :  { %v648_v39 = vmul.f32 %v1751_v33, %v647_v36 }
 0x90f   :  { %v649_v41 = vadd.f32 %v1751_v33, %v648_v39 }
 0x911   :  { %v653_v44 = vsel %vm652_vm11, %v1751_v33, %v649_v41 }
 0x912   :  { %v658_v45 = vsel %vm655_vm12, %v657_v43, %v653_v44 }
 0x913   :  { %v664_v49 = vmul.f32 %v662_v42, %v658_v45  ;;  %v671_v54 = vsub.f32 1.0, %v658_v45 }
 0x915   :  { %666 = vrot.lane.b32.xlu0 %v664_v49, %s1832_s28 }
 0x91d   :  { %677 = vrot.lane.b32.xlu0 %v2161_v56, %s2795_s26 }
 0x987   :  { %v667_v50 = vpop.permute.xlu0 %666 }
 0x988   :  { %v669_v51 = vadd.f32 %v667_v50, %v609_v27  ;;  %v2354_v27 = vld [vmem:[%s2780_s19 + $0x10] ss:$0 sm:$0xff]  ;;  %v802_v50 = vpop.f32.mrf.mxu1 }
 0x98a   :  { %1752 = vtanh.f32 %v669_v51 }
 0x98f   :  { %v678_v53 = vpop.permute.xlu0 %677 }
 0x990   :  { %v1753_v52 = vpop.eup %1752  ;;  %v680_v55 = vmul.f32 %v678_v53, %v658_v45  ;;  %v759_v45 = vpop.f32.mrf.mxu2 }
 0x991   :  { %673 = vrot.lane.b32.xlu1 %v1753_v52, %s1831_s1 }
 0x998   :  { %v762_v49 = vpop.f32.mrf.mxu2 }
 0xa03   :  { %v674_v46 = vpop.permute.xlu1 %673 }
 0xa04   :  { %v676_v48 = vmul.f32 %v674_v46, %v671_v54  ;;  %v760_v54 = vadd.f32 %v2354_v27, %v759_v45  ;;  %v842_v46 = vpop.f32.mrf.mxu2 }
 0xa06   :  { %v681_v47 = vadd.f32 %v680_v55, %v676_v48  ;;  %v2392_v48 = vld [vmem:[%s2780_s19 + $0xe] ss:$0 sm:$0xff] }
 0xa08   :  { %684 = vrot.lane.b32.xlu1 %v681_v47, %s1831_s1 }
 0xa0c   :  { %v845_v19 = vpop.f32.mrf.mxu2 }
 0xa7a   :  { %v685_v57 = vpop.permute.xlu1 %684 }
 0xa7b   :  { %v687_v58 = vsel %vm226_vm8, %v685_v57, 0.0 }
 0xa7c   :  { %688 = vadd.xlane.f32.xlu0 %v687_v58 }
 0xaef   :  { %v689_v61 = vpop.xlane.xlu0 %688 }
 0xaf0   :  { %v690_v56 = vmul.f32 %v689_v61, %v2041_v10 }
 0xaf2   :  { %v691_v62 = vsub.f32 %v681_v47, %v690_v56  ;;  %v766_v47 = vrot.slane %v760_v54, 4 }
 0xaf4   :  { %v692_v0 = vmul.f32 %v691_v62, %v691_v62 }
 0xaf6   :  { %694 = vrot.lane.b32.xlu2 %v692_v0, %s1831_s1 }
 0xafe   :  { %715 = vrot.lane.b32.xlu2 %v1706_v1, %s2795_s26 }
 0xb50   :  { %v695_v2 = vpop.permute.xlu2 %694 }
 0xb51   :  { %v697_v3 = vsel %vm226_vm8, %v695_v2, 0.0 }
 0xb52   :  { %698 = vadd.xlane.f32.xlu1 %v697_v3 }
 0xb58   :  { %v716_v23 = vpop.permute.xlu2 %715 }
 0xb6b   :  { %904 = vrot.lane.b32.xlu1 %v882_v29, %s1831_s1 }
 0xbc5   :  { %v699_v6 = vpop.xlane.xlu1 %698 }
 0xbc6   :  { %v700_v8 = vmul.f32 %v699_v6, %v2041_v10 }
 0xbc8   :  { %v701_v9 = vadd.f32 1e-05, %v700_v8 }
 0xbca   :  { %1754 = vrsqrt.f32 %v701_v9  ;;  %vm708_vm15 = vweird.f32 %v701_v9 }
 0xbd0   :  { %v1755_v11 = vpop.eup %1754 }
 0xbd1   :  { %v703_v12 = vmul.f32 %v1755_v11, %v701_v9  ;;  %vm709_vm14 = vweird.f32 %v1755_v11  ;;  %v2406_v9 = vld [vmem:[%s2780_s19 + $0xd] ss:$0 sm:$0xff] }
 0xbd2   :  { %vm710_vm1 = vmor %vm708_vm15, %vm709_vm14 }
 0xbd3   :  { %v704_v16 = vmul.f32 %v1755_v11, %v703_v12 }
 0xbd5   :  { %v705_v18 = vmul.f32 0.5, %v704_v16 }
 0xbd7   :  { %v706_v20 = vsub.f32 1.5, %v705_v18 }
 0xbd9   :  { %v707_v21 = vmul.f32 %v1755_v11, %v706_v20 }
 0xbdb   :  { %v711_v22 = vsel %vm710_vm1, %v1755_v11, %v707_v21 }
 0xbdc   :  { %v712_v24 = vmul.f32 %v711_v22, %v691_v62 }
 0xbdd   :  { %v905_v43 = vpop.permute.xlu1 %904 }
 0xbde   :  { %v718_v25 = vmul.f32 %v716_v23, %v712_v24  ;;  %1667 = vpush %v905_v43  ;;  %v763_v43 = vadd.f32 %v2354_v27, %v762_v49 }
 0xbe0   :  { %v2347_v26 = vadd.f32 %v1706_v1, %v718_v25  ;;  %v2399_v1 = vld [vmem:[%s2780_s19 + $0xf] ss:$0 sm:$0xff] }
 0xbe2   :  { %858 = vrot.lane.b32.xlu2 %v2347_v26, %s1831_s1 }
 0xbea   :  { %777 = vrot.lane.b32.xlu2 %v2354_v27, %s1831_s1 }
 0xbf2   :  { %819 = vrot.lane.b32.xlu2 %v2354_v27, %s1832_s28 }
 0xbfa   :  { %1050 = vrot.lane.b32.xlu2 %v1029_v30, %s1831_s1 }
 0xc0f   :  { %s1668_s3 = spop %1667 }
 0xc3c   :  { %v859_v31 = vpop.permute.xlu2 %858 }
 0xc3d   :  { %1656 = vmatmul.msk.f32.vlgmr.msrb.gmra.mxu3 %vm105_vm0, %v859_v31 }
 0xc44   :  { %v778_v41 = vpop.permute.xlu2 %777 }
 0xc45   :  { %v803_v51 = vadd.f32 %v802_v50, %v778_v41 }
 0xc47   :  { %v809_v12 = vrot.slane %v803_v51, 4 }
 0xc4c   :  { %v820_v42 = vpop.permute.xlu2 %819 }
 0xc4d   :  { %v843_v55 = vadd.f32 %v842_v46, %v820_v42  ;;  %v846_v24 = vadd.f32 %v845_v19, %v820_v42 }
 0xc4f   :  { %v849_v20 = vrot.slane %v843_v55, 4 }
 0xc54   :  { %v1051_v44 = vpop.permute.xlu2 %1050 }
 0xc55   :  { %1669 = vpush %v1051_v44 }
 0xc86   :  { %s1670_s9 = spop %1669 }
 0xcc0   :  { %v879_v33 = vpop.f32.mrf.mxu3 }
 0xcc1   :  { %v2372_v34 = vadd.f32 %v1709_v32, %v879_v33  ;;  %v805_v33 = vpop.f32.mrf.mxu1 }
 0xcc3   :  { %1206 = vrot.lane.b32.xlu1 %v2372_v34, %s1832_s28  ;;  %v885_v36 = vperm.slane %v2372_v34, 0  ;;  %v884_v38 = vrot.slane %v2372_v34, 1  ;;  %v911_v45 = vadd.f32 %v2372_v34, %v763_v43 }
 0xcc5   :  { %1030 = vrot.lane.b32.xlu2 %v885_v36, %s1831_s1  ;;  %v886_v39 = vperm.slane %v884_v38, 0  ;;  %v889_v17 = vadd.f32 %v885_v36, %v760_v54 }
 0xcc7   :  { %1032 = vrot.lane.b32.xlu0 %v886_v39, %s1831_s1  ;;  %v890_v62 = vadd.f32 %v886_v39, %v766_v47 }
 0xccd   :  { %1179 = vrot.lane.b32.xlu2 %v885_v36, %s1832_s28  ;;  %v806_v36 = vadd.f32 %v805_v33, %v778_v41 }
 0xccf   :  { %1181 = vrot.lane.b32.xlu0 %v886_v39, %s1832_s28 }
 0xcd5   :  { %1199 = vrot.lane.b32.xlu2 %v1178_v40, %s1831_s1 }
 0xcd7   :  { %1057 = vrot.lane.b32.xlu0 %v2372_v34, %s1831_s1 }
 0xd1f   :  { %v1031_v52 = vpop.permute.xlu2 %1030 }
 0xd20   :  { %v1036_v53 = vadd.f32 %v1031_v52, %v803_v51 }
 0xd22   :  { %1756 = vtanh.f32 %v1036_v53 }
 0xd27   :  { %v1180_v57 = vpop.permute.xlu2 %1179 }
 0xd28   :  { %v1757_v58 = vpop.eup %1756  ;;  %v1185_v61 = vadd.f32 %v1180_v57, %v843_v55 }
 0xd29   :  { %v1041_v56 = vmul.f32 %v1757_v58, %v2392_v48  ;;  %v1053_v58 = vstv %s1670_s9 }
 0xd2a   :  { %1758 = vtanh.f32 %v1185_v61 }
 0xd2b   :  { %v1043_v0 = vsel %vm896_vm4, %v1041_v56, 0.0  ;;  %1760 = vtanh.f32 %v890_v62 }
 0xd2c   :  { %1044 = vadd.xlane.f32.xlu2 %v1043_v0 }
 0xd2f   :  { %v1200_v18 = vpop.permute.xlu2 %1199 }
 0xd30   :  { %v1759_v2 = vpop.eup %1758  ;;  %1671 = vpush %v1200_v18 }
 0xd31   :  { %v1190_v3 = vmul.f32 %v1759_v2, %v2399_v1  ;;  %v1761_v8 = vpop.eup %1760 }
 0xd32   :  { %v895_v11 = vmul.f32 %v1761_v8, %v2406_v9 }
 0xd33   :  { %v1192_v6 = vsel %vm896_vm4, %v1190_v3, 0.0  ;;  %v907_v3 = vstv %s1668_s3 }
 0xd34   :  { %1193 = vadd.xlane.f32.xlu1 %v1192_v6  ;;  %v900_v16 = vsel %vm896_vm4, %v895_v11, 0.0 }
 0xd35   :  { %v1207_v21 = vpop.permute.xlu1 %1206 }
 0xd36   :  { %v1209_v30 = vadd.f32 %v1207_v21, %v846_v24 }
 0xd39   :  { %v1033_v13 = vpop.permute.xlu0 %1032 }
 0xd3a   :  { %v1037_v15 = vadd.f32 %v1033_v13, %v809_v12 }
 0xd3c   :  { %1762 = vtanh.f32 %v1037_v15  ;;  %901 = vadd.xlane.f32.xlu1 %v900_v16 }
 0xd3d   :  { %1764 = vtanh.f32 %v889_v17 }
 0xd41   :  { %v1182_v22 = vpop.permute.xlu0 %1181 }
 0xd42   :  { %v1763_v23 = vpop.eup %1762  ;;  %v1186_v25 = vadd.f32 %v1182_v22, %v849_v20 }
 0xd43   :  { %v1042_v29 = vmul.f32 %v1763_v23, %v2392_v48  ;;  %v1765_v32 = vpop.eup %1764 }
 0xd44   :  { %1766 = vtanh.f32 %v1186_v25  ;;  %v894_v39 = vmul.f32 %v1765_v32, %v2406_v9 }
 0xd45   :  { %v1046_v31 = vsel %vm896_vm4, %v1042_v29, 0.0  ;;  %1768 = vtanh.f32 %v1209_v30 }
 0xd46   :  { %1047 = vadd.xlane.f32.xlu0 %v1046_v31  ;;  %v897_v50 = vsel %vm896_vm4, %v894_v39, 0.0  ;;  %v1835_v31 = vmov 32  }
 0xd47   :  { %1683 = vset.pattern.permute.xlu2 %v1835_v31  ;;  %1685 = vset.pattern.permute.xlu1 %v1835_v31 }
 0xd48   :  { %1684 = vset.pattern.permute.xlu0 %v1835_v31 }
 0xd49   :  { %v1058_v38 = vpop.permute.xlu0 %1057 }
 0xd4a   :  { %v1767_v40 = vpop.eup %1766  ;;  %v1060_v44 = vadd.f32 %v1058_v38, %v806_v36 }
 0xd4b   :  { %v1191_v42 = vmul.f32 %v1767_v40, %v2399_v1  ;;  %v1769_v52 = vpop.eup %1768 }
 0xd4c   :  { %1770 = vtanh.f32 %v1060_v44  ;;  %v1211_v41 = vmul.f32 %v1769_v52, %v2399_v1 }
 0xd4d   :  { %v1195_v51 = vsel %vm896_vm4, %v1191_v42, 0.0  ;;  %1772 = vtanh.f32 %v911_v45 }
 0xd4e   :  { %898 = vadd.xlane.f32.xlu0 %v897_v50  ;;  %1196 = vadd.xlane.f32.xlu2 %v1195_v51  ;;  %v1212_v27 = vsel %vm226_vm8, %v1211_v41, 0.0 }
 0xd52   :  { %v1771_v53 = vpop.eup %1770 }
 0xd53   :  { %v1062_v54 = vmul.f32 %v1771_v53, %v2392_v48  ;;  %v1773_v46 = vpop.eup %1772 }
 0xd54   :  { %v913_v34 = vmul.f32 %v1773_v46, %v2406_v9 }
 0xd55   :  { %v1063_v49 = vsel %vm226_vm8, %v1062_v54, 0.0 }
 0xd56   :  { %1213 = vadd.xlane.f32.xlu0 %v1212_v27  ;;  %1064 = vadd.xlane.f32.xlu2 %v1063_v49  ;;  %v914_v55 = vsel %vm226_vm8, %v913_v34, 0.0 }
 0xd5e   :  { %915 = vadd.xlane.f32.xlu0 %v914_v55 }
 0xd61   :  { %s1672_s17 = spop %1671 }
 0xd62   :  { %v1202_v6 = vstv %s1672_s17 }
 0xd9f   :  { %v1045_v57 = vpop.xlane.xlu2 %1044 }
 0xda0   :  { %v1055_v61 = vadd.f32 %v1053_v58, %v1045_v57 }
 0xda2   :  { %v1069_v0 = vperm.slane %v1055_v61, %v2106_v14 }
 0xda7   :  { %v1194_v47 = vpop.xlane.xlu1 %1193 }
 0xda8   :  { %v1204_v13 = vadd.f32 %v1202_v6, %v1194_v47 }
 0xdaa   :  { %v1218_v20 = vperm.slane %v1204_v13, %v2106_v14 }
 0xdaf   :  { %v902_v8 = vpop.xlane.xlu1 %901 }
 0xdb0   :  { %v910_v15 = vadd.f32 %v907_v3, %v902_v8 }
 0xdb2   :  { %v921_v21 = vperm.slane %v910_v15, %v2106_v14 }
 0xdb9   :  { %v1048_v56 = vpop.xlane.xlu0 %1047 }
 0xdba   :  { %v1056_v62 = vadd.f32 %v1053_v58, %v1048_v56 }
 0xdbc   :  { %v1070_v2 = vperm.slane %v1056_v62, %v2106_v14 }
 0xdbe   :  { %v1071_v11 = vsel %vm336_vm13, %v1070_v2, %v1069_v0 }
 0xdbf   :  { %v1073_v12 = vsel %vm924_vm5, %v1071_v11, -inf }
 0xdc0   :  { %1074 = vmax.xlane.f32.xlu1 %v1073_v12 }
 0xdc1   :  { %v899_v16 = vpop.xlane.xlu0 %898  ;;  %v1197_v17 = vpop.xlane.xlu2 %1196 }
 0xdc2   :  { %v2428_v18 = vadd.f32 %v907_v3, %v899_v16  ;;  %v1205_v19 = vadd.f32 %v1202_v6, %v1197_v17 }
 0xdc4   :  { %v920_v22 = vperm.slane %v2428_v18, %v2106_v14  ;;  %v1219_v23 = vperm.slane %v1205_v19, %v2106_v14 }
 0xdc6   :  { %v922_v24 = vsel %vm336_vm13, %v921_v21, %v920_v22  ;;  %v1220_v25 = vsel %vm336_vm13, %v1219_v23, %v1218_v20 }
 0xdc7   :  { %v925_v29 = vsel %vm924_vm5, %v922_v24, -inf  ;;  %v1222_v30 = vsel %vm924_vm5, %v1220_v25, -inf }
 0xdc8   :  { %926 = vmax.xlane.f32.xlu1 %v925_v29  ;;  %1223 = vmax.xlane.f32.xlu2 %v1222_v30 }
 0xdc9   :  { %v1214_v32 = vpop.xlane.xlu0 %1213  ;;  %v1065_v33 = vpop.xlane.xlu2 %1064 }
 0xdca   :  { %v2443_v36 = vadd.f32 %v2392_v48, %v1065_v33  ;;  %v1215_v44 = vadd.f32 %v2399_v1, %v1214_v32 }
 0xdd1   :  { %v916_v43 = vpop.xlane.xlu0 %915 }
 0xdd2   :  { %v2453_v42 = vadd.f32 %v2406_v9, %v916_v43 }
 0xe33   :  { %v1075_v38 = vpop.xlane.xlu1 %1074 }
 0xe34   :  { %v2446_v39 = vmax.f32 %v1075_v38, %v2443_v36 }
 0xe36   :  { %v1091_v40 = vsub.f32 %v2443_v36, %v2446_v39  ;;  %1079 = vperm.xlu2 %1683, %v2446_v39  }
 0xe3b   :  { %v927_v45 = vpop.xlane.xlu1 %926  ;;  %v1224_v50 = vpop.xlane.xlu2 %1223 }
 0xe3c   :  { %v2456_v48 = vmax.f32 %v927_v45, %v2453_v42  ;;  %v1225_v51 = vmax.f32 %v1224_v50, %v1215_v44 }
 0xe3e   :  { %v943_v52 = vsub.f32 %v2453_v42, %v2456_v48  ;;  %v1240_v41 = vsub.f32 %v1215_v44, %v1225_v51  ;;  %931 = vperm.xlu1 %1685, %v2456_v48   ;;  %1228 = vperm.xlu0 %1684, %v1225_v51  }
 0xe3f   :  { %1686 = vset.pattern.permute.xlu2 %v1834_v28 }
 0xe40   :  { %v1241_v12 = vmul.f32 1.442695, %v1240_v41 }
 0xe46   :  { %1687 = vset.pattern.permute.xlu1 %v1834_v28  ;;  %1688 = vset.pattern.permute.xlu0 %v1834_v28 }
 0xe90   :  { %v1080_v1 = vpop.permute.xlu2 %1079 }
 0xe91   :  { %v1081_v9 = vperm.slane %v1080_v1, 0  ;;  %v1082_v53 = vperm.slane %v1080_v1, 1 }
 0xe93   :  { %v1085_v54 = vsub.f32 %v1055_v61, %v1081_v9  ;;  %v1086_v27 = vsub.f32 %v1056_v62, %v1082_v53  ;;  %v1092_v53 = vmul.f32 1.442695, %v1091_v40 }
 0xe95   :  { %v1087_v49 = vmul.f32 1.442695, %v1085_v54  ;;  %v1089_v46 = vmul.f32 1.442695, %v1086_v27 }
 0xe97   :  { %1774 = vpow2.f32 %v1087_v49  ;;  %v944_v49 = vmul.f32 1.442695, %v943_v52 }
 0xe98   :  { %1776 = vpow2.f32 %v1089_v46 }
 0xe9d   :  { %v1775_v34 = vpop.eup %1774 }
 0xe9e   :  { %v1777_v55 = vpop.eup %1776  ;;  %1097 = vperm.xlu2 %1686, %v1775_v34  }
 0xe9f   :  { %1100 = vperm.xlu1 %1687, %v1777_v55  }
 0xeb0   :  { %v932_v47 = vpop.permute.xlu1 %931  ;;  %v1229_v57 = vpop.permute.xlu0 %1228 }
 0xeb1   :  { %v934_v58 = vperm.slane %v932_v47, 1  ;;  %v1230_v56 = vperm.slane %v1229_v57, 0  ;;  %v1231_v0 = vperm.slane %v1229_v57, 1  ;;  %v933_v6 = vperm.slane %v932_v47, 0 }
 0xeb3   :  { %v938_v2 = vsub.f32 %v910_v15, %v934_v58  ;;  %v1234_v28 = vsub.f32 %v1204_v13, %v1230_v56  ;;  %v1235_v3 = vsub.f32 %v1205_v19, %v1231_v0  ;;  %v937_v11 = vsub.f32 %v2428_v18, %v933_v6 }
 0xeb5   :  { %v941_v8 = vmul.f32 1.442695, %v938_v2  ;;  %v1236_v61 = vmul.f32 1.442695, %v1234_v28  ;;  %v1238_v62 = vmul.f32 1.442695, %v1235_v3 }
 0xeb6   :  { %v939_v16 = vmul.f32 1.442695, %v937_v11 }
 0xeb7   :  { %1778 = vpow2.f32 %v941_v8 }
 0xeb8   :  { %1780 = vpow2.f32 %v1236_v61 }
 0xeb9   :  { %1782 = vpow2.f32 %v1238_v62 }
 0xeba   :  { %1784 = vpow2.f32 %v1241_v12 }
 0xebb   :  { %1786 = vpow2.f32 %v939_v16 }
 0xebc   :  { %1788 = vpow2.f32 %v1092_v53 }
 0xebd   :  { %v1779_v17 = vpop.eup %1778  ;;  %1790 = vpow2.f32 %v944_v49 }
 0xebe   :  { %v1781_v20 = vpop.eup %1780  ;;  %952 = vperm.xlu0 %1688, %v1779_v17  }
 0xebf   :  { %v1783_v21 = vpop.eup %1782  ;;  %1246 = vperm.xlu2 %1686, %v1781_v20  }
 0xec0   :  { %1249 = vperm.xlu1 %1687, %v1783_v21   ;;  %v1785_v13 = vpop.eup %1784 }
 0xec1   :  { %v1787_v15 = vpop.eup %1786 }
 0xec6   :  { %1689 = vset.pattern.permute.xlu0 %v1835_v31 }
 0xec7   :  { %949 = vperm.xlu2 %1686, %v1787_v15   ;;  %1279 = vperm.xlu0 %1689, %v1785_v13  }
 0xec8   :  { %1691 = vset.pattern.permute.xlu1 %v1835_v31 }
 0xecf   :  { %1690 = vset.pattern.permute.xlu2 %v1835_v31 }
 0xef8   :  { %v1098_v18 = vpop.permute.xlu2 %1097 }
 0xef9   :  { %v1102_v22 = vperm.slane %v1098_v18, %v2106_v14  ;;  %v1112_v39 = vmul.f32 %v1098_v18, %v2186_v63 }
 0xefb   :  { %v1114_v57 = vsel %vm896_vm4, %v1112_v39, 0.0 }
 0xefc   :  { %v1115_v48 = vrot.slane %v1114_v57, 4 }
 0xefe   :  { %v1116_v58 = vadd.f32 %v1115_v48, %v1114_v57 }
 0xf00   :  { %v1117_v28 = vrot.slane %v1116_v58, 2 }
 0xf02   :  { %v1118_v61 = vadd.f32 %v1117_v28, %v1116_v58 }
 0xf04   :  { %v1119_v17 = vrot.slane %v1118_v61, 1 }
 0xf11   :  { %v1101_v19 = vpop.permute.xlu1 %1100 }
 0xf12   :  { %v1103_v23 = vperm.slane %v1101_v19, %v2106_v14  ;;  %v1113_v40 = vmul.f32 %v1101_v19, %v2177_v60 }
 0xf14   :  { %v1104_v24 = vsel %vm336_vm13, %v1103_v23, %v1102_v22  ;;  %v1121_v42 = vsel %vm896_vm4, %v1113_v40, 0.0 }
 0xf15   :  { %v1106_v25 = vsel %vm924_vm5, %v1104_v24, 0.0  ;;  %v1122_v52 = vrot.slane %v1121_v42, 4 }
 0xf16   :  { %1107 = vadd.xlane.f32.xlu1 %v1106_v25 }
 0xf17   :  { %v1123_v56 = vadd.f32 %v1122_v52, %v1121_v42 }
 0xf19   :  { %v2472_v29 = vpop.permute.xlu2 %1246  ;;  %v1124_v3 = vrot.slane %v1123_v56, 2 }
 0xf1a   :  { %v1251_v43 = vperm.slane %v2472_v29, %v2106_v14  ;;  %v1261_v49 = vmul.f32 %v2472_v29, %v2282_v7 }
 0xf1b   :  { %v1125_v8 = vadd.f32 %v1124_v3, %v1123_v56 }
 0xf1d   :  { %v1126_v20 = vrot.slane %v1125_v8, 1 }
 0xf21   :  { %v2474_v30 = vpop.permute.xlu2 %949 }
 0xf22   :  { %v954_v31 = vperm.slane %v2474_v30, %v2106_v14 }
 0xf30   :  { %v2476_v32 = vpop.permute.xlu0 %952 }
 0xf31   :  { %v955_v33 = vperm.slane %v2476_v32, %v2106_v14 }
 0xf32   :  { %v2482_v38 = vpop.permute.xlu1 %1249 }
 0xf33   :  { %v1252_v44 = vperm.slane %v2482_v38, %v2106_v14  ;;  %v956_v45 = vsel %vm336_vm13, %v955_v33, %v954_v31  ;;  %v1789_v14 = vpop.eup %1788  ;;  %v1127_v31 = vadd.f32 %v1126_v20, %v1125_v8 }
 0xf34   :  { %v958_v50 = vsel %vm924_vm5, %v956_v45, 0.0  ;;  %v1791_v46 = vpop.eup %1790 }
 0xf35   :  { %v1253_v51 = vsel %vm336_vm13, %v1252_v44, %v1251_v43  ;;  %959 = vadd.xlane.f32.xlu0 %v958_v50 }
 0xf36   :  { %v1255_v41 = vsel %vm924_vm5, %v1253_v51, 0.0 }
 0xf37   :  { %1256 = vadd.xlane.f32.xlu2 %v1255_v41 }
 0xf39   :  { %v1280_v1 = vpop.permute.xlu0 %1279 }
 0xf3a   :  { %v1282_v9 = vmul.f32 %v1280_v1, %v2063_v35 }
 0xf3c   :  { %v1284_v36 = vrot.slane %v1282_v9, 1 }
 0xf49   :  { %1285 = vrot.lane.b32.xlu0 %v1282_v9, %s1831_s1 }
 0xf89   :  { %v1108_v54 = vpop.xlane.xlu1 %1107 }
 0xf8a   :  { %v1109_v27 = vadd.f32 %v1789_v14, %v1108_v54 }
 0xf8c   :  { %1143 = vperm.xlu2 %1690, %v1109_v27  }
 0xf94   :  { %1130 = vperm.xlu2 %1690, %v1789_v14  }
 0xfa8   :  { %v960_v34 = vpop.xlane.xlu0 %959 }
 0xfa9   :  { %v961_v35 = vadd.f32 %v1791_v46, %v960_v34  ;;  %v1263_v34 = vsel %vm896_vm4, %v1261_v49, 0.0  ;;  %v1365_v49 = vld [vmem:[%s2775_s14 + $0x130] sm:$0xff] }
 0xfaa   :  { %v1257_v55 = vpop.xlane.xlu2 %1256 }
 0xfab   :  { %v1258_v47 = vadd.f32 %v1785_v13, %v1257_v55  ;;  %994 = vperm.xlu2 %1690, %v961_v35   ;;  %v1264_v55 = vrot.slane %v1263_v34, 4 }
 0xfad   :  { %1295 = vperm.xlu1 %1691, %v1258_v47  }
 0xfb5   :  { %1287 = vrot.lane.b32.xlu1 %v1284_v36, %s1831_s1  ;;  %v1265_v36 = vadd.f32 %v1264_v55, %v1263_v34  ;;  %v1363_v34 = vld [vmem:[%s2775_s14 + $0x120] sm:$0xff]  ;;  %v1361_v55 = vld [vmem:[%s2775_s14 + $0x110] sm:$0xff] }
 0xfb7   :  { %v1266_v42 = vrot.slane %v1265_v36, 2 }
 0xfb9   :  { %v1267_v58 = vadd.f32 %v1266_v42, %v1265_v36  ;;  %v1359_v36 = vld [vmem:[%s2775_s14 + $0x100] sm:$0xff] }
 0xfba   :  { %v1813_v42 = vld [vmem:[%s2772_s11 + $0x4] sm:$0xf] }
 0xfbd   :  { %982 = vperm.xlu1 %1691, %v1791_v46   ;;  %v1262_v46 = vmul.f32 %v2482_v38, %v2269_v4 }
 0xfbf   :  { %v1270_v35 = vsel %vm896_vm4, %v1262_v46, 0.0  ;;  %v1364_v46 = vld [vmem:[%s2775_s14 + $0x128] sm:$0xff] }
 0xfc0   :  { %v1271_v47 = vrot.slane %v1270_v35, 4 }
 0xfc2   :  { %v1272_v39 = vadd.f32 %v1271_v47, %v1270_v35  ;;  %v1362_v35 = vld [vmem:[%s2775_s14 + $0x118] sm:$0xff]  ;;  %v1360_v47 = vld [vmem:[%s2775_s14 + $0x108] sm:$0xff] }
 0xfc4   :  { %v1273_v48 = vrot.slane %v1272_v39, 2 }
 0xfc6   :  { %v1274_v29 = vadd.f32 %v1273_v48, %v1272_v39  ;;  %v1358_v39 = vld [vmem:[%s2775_s14 + $0xf8] sm:$0xff]  ;;  %v965_v48 = vmul.f32 %v1813_v42, %v2476_v32 }
 0xfc8   :  { %v1275_v28 = vrot.slane %v1274_v29, 1 }
 0xfe6   :  { %v1144_v0 = vpop.permute.xlu2 %1143 }
 0xfe7   :  { %v1145_v2 = vrot.slane %v1144_v0, 1  ;;  %1792 = vrcp.f32 %v1144_v0  ;;  %vm1153_vm6 = vweird.f32 %v1144_v0  ;;  %v1157_v15 = vand.u32 2147483647, %v1144_v0 }
 0xfe8   :  { %v1159_v18 = vand.u32 2147483648, %v1144_v0 }
 0xfe9   :  { %1794 = vrcp.f32 %v1145_v2  ;;  %v1172_v19 = vand.u32 2147483647, %v1145_v2  ;;  %v1174_v22 = vand.u32 2147483648, %v1145_v2  ;;  %vm1168_vm12 = vweird.f32 %v1145_v2 }
 0xfea   :  { %v1160_v44 = vor.u32 1.1754944e-38, %v1159_v18  ;;  %vm1158_vm15 = vcmp.eq.f32.partialorder %v1157_v15, 8.507059e+37 }
 0xfeb   :  { %v1175_v45 = vor.u32 1.1754944e-38, %v1174_v22  ;;  %vm1173_vm1 = vcmp.eq.f32.partialorder %v1172_v19, 8.507059e+37 }
 0xfed   :  { %v1793_v6 = vpop.eup %1792 }
 0xfee   :  { %v1149_v63 = vmul.f32 %v1793_v6, %v1144_v0  ;;  %v1131_v62 = vpop.permute.xlu2 %1130  ;;  %vm1154_vm9 = vweird.f32 %v1793_v6  ;;  %v1268_v0 = vrot.slane %v1267_v58, 1 }
 0xfef   :  { %v1795_v60 = vpop.eup %1794  ;;  %v1134_v16 = vmul.f32 %v1131_v62, %v2255_v59  ;;  %vm1155_vm11 = vmor %vm1153_vm6, %vm1154_vm9  ;;  %v1120_v59 = vadd.f32 %v1119_v17, %v1118_v61 }
 0xff0   :  { %v1150_v11 = vsub.f32 1.0, %v1149_v63  ;;  %v1164_v12 = vmul.f32 %v1795_v60, %v1145_v2  ;;  %vm1169_vm10 = vweird.f32 %v1795_v60 }
 0xff1   :  { %v1136_v25 = vrot.slane %v1134_v16, 1  ;;  %vm1170_vm14 = vmor %vm1168_vm12, %vm1169_vm10  ;;  %v1139_v9 = vadd.f32 %v1134_v16, %v1120_v59  ;;  %v1276_v16 = vadd.f32 %v1275_v28, %v1274_v29 }
 0xff2   :  { %v1151_v21 = vmul.f32 %v1793_v6, %v1150_v11  ;;  %v1165_v13 = vsub.f32 1.0, %v1164_v12 }
 0xff3   :  { %v1140_v51 = vadd.f32 %v1136_v25, %v1127_v31 }
 0xff4   :  { %v1152_v23 = vadd.f32 %v1793_v6, %v1151_v21  ;;  %v1166_v24 = vmul.f32 %v1795_v60, %v1165_v13  ;;  %v1269_v21 = vadd.f32 %v1268_v0, %v1267_v58  ;;  %v1286_v13 = vpop.permute.xlu0 %1285  ;;  %v973_v58 = vsel %vm896_vm4, %v965_v48, 0.0  ;;  %v1712_v48 = vld [vmem:[%s2780_s19 + $0x4] ss:$0 sm:$0xff] }
 0xff6   :  { %v1156_v33 = vsel %vm1155_vm11, %v1793_v6, %v1152_v23  ;;  %v1167_v43 = vadd.f32 %v1795_v60, %v1166_v24  ;;  %v1291_v25 = vadd.f32 %v1286_v13, %v1269_v21 }
 0xff7   :  { %v1161_v41 = vsel %vm1158_vm15, %v1160_v44, %v1156_v33 }
 0xff8   :  { %v1171_v50 = vsel %vm1170_vm14, %v1795_v60, %v1167_v43  ;;  %v1162_v14 = vmul.f32 %v1161_v41, %v1139_v9  ;;  %v1369_v41 = vld [vmem:[%s2775_s14 + $0x150] sm:$0xff]  ;;  %v1368_v9 = vld [vmem:[%s2775_s14 + $0x148] sm:$0xff] }
 0xff9   :  { %v1176_v1 = vsel %vm1173_vm1, %v1175_v45, %v1171_v50  ;;  %v1396_v45 = vld [vmem:[%s2775_s14 + $0x1b8] sm:$0xff]  ;;  %v1395_v50 = vld [vmem:[%s2775_s14 + $0x1b0] sm:$0xff] }
 0xffa   :  { %v1177_v53 = vmul.f32 %v1176_v1, %v1140_v51  ;;  %1413 = vmatpush.msrb.mxu0 %v1396_v45  ;;  %v1370_v51 = vld [vmem:[%s2775_s14 + $0x158] sm:$0xff]  ;;  %v1394_v1 = vld [vmem:[%s2775_s14 + $0x1a8] sm:$0xff] }
 0xffb   :  { %1373 = vmatpush.msrb.mxu1 %v1370_v51 }
 0xffc   :  { %v1337_v54 = vrot.slane %v1177_v53, 7  ;;  %1414 = vmatpush.msrb.mxu0 %v1395_v50  ;;  %v1393_v53 = vld [vmem:[%s2775_s14 + $0x1a0] sm:$0xff] }
 0xffd   :  { %1374 = vmatpush.msrb.mxu1 %v1369_v41 }
 0xffe   :  { %v1338_v27 = vsel %vm336_vm13, %v1337_v54, %v1162_v14  ;;  %1415 = vmatpush.msrb.mxu0 %v1394_v1  ;;  %v1367_v14 = vld [vmem:[%s2775_s14 + $0x140] sm:$0xff]  ;;  %v1366_v54 = vld [vmem:[%s2775_s14 + $0x138] sm:$0xff] }
 0xfff   :  { %1339 = vrot.lane.b32.xlu2 %v1338_v27, %s2795_s26  ;;  %1375 = vmatpush.msrb.mxu1 %v1368_v9  ;;  %v2553_v27 = vld [vmem:[%s2767_s6] sm:$0x3] }
0x1000   :  { %1416 = vmatpush.msrb.mxu0 %v1393_v53 }
0x1001   :  { %1657 = vmatmul.msk.f32.vlgmr.msrb.gmra.mxu0 %vm105_vm0, %v2553_v27  ;;  %1376 = vmatpush.msrb.mxu1 %v1367_v14 }
0x1003   :  { %1377 = vmatpush.msrb.mxu1 %v1366_v54 }
0x1005   :  { %1378 = vmatpush.msrb.mxu1 %v1365_v49 }
0x1007   :  { %1379 = vmatpush.msrb.mxu1 %v1364_v46 }
0x1009   :  { %1380 = vmatpush.msrb.mxu1 %v1363_v34 }
0x100b   :  { %1381 = vmatpush.msrb.mxu1 %v1362_v35 }
0x100d   :  { %1382 = vmatpush.msrb.mxu1 %v1361_v55 }
0x100f   :  { %1383 = vmatpush.msrb.mxu1 %v1360_v47 }
0x1011   :  { %1384 = vmatpush.msrb.mxu1 %v1359_v36 }
0x1013   :  { %1385 = vmatpush.msrb.mxu1 %v1358_v39 }
0x101f   :  { %v1296_v40 = vpop.permute.xlu1 %1295 }
0x1020   :  { %v1297_v57 = vrot.slane %v1296_v40, 1  ;;  %1796 = vrcp.f32 %v1296_v40  ;;  %vm1305_vm6 = vweird.f32 %v1296_v40  ;;  %v1309_v6 = vand.u32 2147483647, %v1296_v40 }
0x1021   :  { %v1311_v8 = vand.u32 2147483648, %v1296_v40 }
0x1022   :  { %1798 = vrcp.f32 %v1297_v57  ;;  %v1326_v61 = vand.u32 2147483648, %v1297_v57  ;;  %v1324_v60 = vand.u32 2147483647, %v1297_v57  ;;  %vm1320_vm11 = vweird.f32 %v1297_v57 }
0x1023   :  { %v1312_v15 = vor.u32 1.1754944e-38, %v1311_v8  ;;  %vm1310_vm14 = vcmp.eq.f32.partialorder %v1309_v6, 8.507059e+37 }
0x1024   :  { %v1327_v18 = vor.u32 1.1754944e-38, %v1326_v61  ;;  %vm1325_vm15 = vcmp.eq.f32.partialorder %v1324_v60, 8.507059e+37 }
0x1026   :  { %v1797_v52 = vpop.eup %1796 }
0x1027   :  { %v1301_v7 = vmul.f32 %v1797_v52, %v1296_v40  ;;  %vm1306_vm5 = vweird.f32 %v1797_v52  ;;  %v1288_v12 = vpop.permute.xlu1 %1287  ;;  %v1357_v40 = vld [vmem:[%s2775_s14 + $0xf0] sm:$0xff] }
0x1028   :  { %v1799_v56 = vpop.eup %1798  ;;  %vm2514_vm10 = vmor %vm1305_vm6, %vm1306_vm5  ;;  %v1292_v22 = vadd.f32 %v1288_v12, %v1276_v16  ;;  %1386 = vmatpush.msrb.mxu1 %v1357_v40  ;;  %v1711_v40 = vld [vmem:[%s2780_s19 + $0x5] ss:$0 sm:$0xff] }
0x1029   :  { %v1302_v4 = vsub.f32 1.0, %v1301_v7  ;;  %v1316_v38 = vmul.f32 %v1799_v56, %v1297_v57  ;;  %vm1321_vm9 = vweird.f32 %v1799_v56  ;;  %v995_v57 = vpop.permute.xlu2 %994  ;;  %v1814_v7 = vld [vmem:[%s2772_s11] sm:$0xf] }
0x102a   :  { %vm1322_vm12 = vmor %vm1320_vm11, %vm1321_vm9  ;;  %v964_v29 = vmul.f32 %v1814_v7, %v2474_v30  ;;  %v1008_v50 = vand.u32 2147483647, %v995_v57 }
0x102b   :  { %v1303_v2 = vmul.f32 %v1797_v52, %v1302_v4  ;;  %v1317_v3 = vsub.f32 1.0, %v1316_v38  ;;  %v1356_v4 = vld [vmem:[%s2775_s14 + $0xe8] sm:$0xff]  ;;  %v1355_v38 = vld [vmem:[%s2775_s14 + $0xe0] sm:$0xff] }
0x102c   :  { %v966_v0 = vsel %vm896_vm4, %v964_v29, 0.0  ;;  %1387 = vmatpush.msrb.mxu1 %v1356_v4 }
0x102d   :  { %v1304_v63 = vadd.f32 %v1797_v52, %v1303_v2  ;;  %v1318_v62 = vmul.f32 %v1799_v56, %v1317_v3  ;;  %v967_v28 = vrot.slane %v966_v0, 4 }
0x102e   :  { %1388 = vmatpush.msrb.mxu1 %v1355_v38 }
0x102f   :  { %v1319_v17 = vadd.f32 %v1799_v56, %v1318_v62  ;;  %v1308_v20 = vsel %vm2514_vm10, %v1797_v52, %v1304_v63  ;;  %v996_v52 = vrot.slane %v995_v57, 1  ;;  %v968_v8 = vadd.f32 %v967_v28, %v966_v0  ;;  %v983_v63 = vpop.permute.xlu1 %982 }
0x1030   :  { %v1313_v24 = vsel %vm1310_vm14, %v1312_v15, %v1308_v20  ;;  %v985_v12 = vmul.f32 %v983_v63, %v2272_v5  ;;  %vm1004_vm10 = vweird.f32 %v995_v57 }
0x1031   :  { %v1323_v19 = vsel %vm1322_vm12, %v1799_v56, %v1319_v17  ;;  %v1314_v43 = vmul.f32 %v1313_v24, %v1291_v25  ;;  %1800 = vrcp.f32 %v996_v52  ;;  %v974_v56 = vrot.slane %v973_v58, 4 }
0x1032   :  { %v1328_v23 = vsel %vm1325_vm15, %v1327_v18, %v1323_v19  ;;  %1802 = vrcp.f32 %v995_v57  ;;  %v969_v11 = vrot.slane %v968_v8, 2  ;;  %v987_v13 = vrot.slane %v985_v12, 1 }
0x1033   :  { %v1329_v31 = vmul.f32 %v1328_v23, %v1292_v22  ;;  %v975_v2 = vadd.f32 %v974_v56, %v973_v58  ;;  %v1025_v18 = vand.u32 2147483648, %v996_v52  ;;  %vm1019_vm1 = vweird.f32 %v996_v52 }
0x1034   :  { %v970_v21 = vadd.f32 %v969_v11, %v968_v8  ;;  %v1023_v23 = vand.u32 2147483647, %v996_v52  ;;  %vm1009_vm12 = vcmp.eq.f32.partialorder %v1008_v50, 8.507059e+37  ;;  %v1542_v50 = vld [vmem:[%s2779_s18 + $0x110] sm:$0xff] }
0x1035   :  { %v1344_v33 = vrot.slane %v1329_v31, 7  ;;  %v976_v6 = vrot.slane %v975_v2, 2  ;;  %1580 = vmatpush.msra.mxu3 %v1542_v50 }
0x1036   :  { %v971_v24 = vrot.slane %v970_v21, 1  ;;  %vm1024_vm9 = vcmp.eq.f32.partialorder %v1023_v23, 8.507059e+37 }
0x1037   :  { %v1345_v59 = vsel %vm336_vm13, %v1344_v33, %v1314_v43  ;;  %v1801_v32 = vpop.eup %1800  ;;  %v977_v62 = vadd.f32 %v976_v6, %v975_v2  ;;  %v1026_v33 = vor.u32 1.1754944e-38, %v1025_v18 }
0x1038   :  { %v1692_v44 = vpack.i.bf16 %v2347_v26, %v1345_v59  ;;  %v1015_v3 = vmul.f32 %v1801_v32, %v996_v52  ;;  %v1803_v30 = vpop.eup %1802  ;;  %vm1020_vm4 = vweird.f32 %v1801_v32  ;;  %v1010_v59 = vand.u32 2147483648, %v995_v57 }
0x1039   :  { %v1000_v60 = vmul.f32 %v1803_v30, %v995_v57  ;;  %v978_v20 = vrot.slane %v977_v62, 1  ;;  %vm1021_vm5 = vmor %vm1019_vm1, %vm1020_vm4  ;;  %vm1005_vm6 = vweird.f32 %v1803_v30  ;;  %v972_v45 = vadd.f32 %v971_v24, %v970_v21 }
0x103a   :  { %1693 = vrot.lane.b32.xlu1 %v1692_v44, %s1832_s28  ;;  %v1016_v61 = vsub.f32 1.0, %v1015_v3  ;;  %vm1006_vm11 = vmor %vm1004_vm10, %vm1005_vm6  ;;  %v1011_v9 = vor.u32 1.1754944e-38, %v1010_v59 }
0x103b   :  { %v1001_v17 = vsub.f32 1.0, %v1000_v60  ;;  %v979_v19 = vadd.f32 %v978_v20, %v977_v62  ;;  %v990_v41 = vadd.f32 %v985_v12, %v972_v45  ;;  %v1541_v45 = vld [vmem:[%s2779_s18 + $0x108] sm:$0xff] }
0x103c   :  { %v1017_v16 = vmul.f32 %v1801_v32, %v1016_v61  ;;  %1560 = vmatpush.msrb.mxu2 %v1541_v45 }
0x103d   :  { %v1002_v22 = vmul.f32 %v1803_v30, %v1001_v17  ;;  %v991_v25 = vadd.f32 %v987_v13, %v979_v19 }
0x103e   :  { %v1018_v15 = vadd.f32 %v1801_v32, %v1017_v16 }
0x103f   :  { %v1003_v43 = vadd.f32 %v1803_v30, %v1002_v22 }
0x1040   :  { %v1022_v31 = vsel %vm1021_vm5, %v1801_v32, %v1018_v15 }
0x1041   :  { %v1027_v44 = vsel %vm1024_vm9, %v1026_v33, %v1022_v31  ;;  %v1007_v1 = vsel %vm1006_vm11, %v1803_v30, %v1003_v43 }
0x1042   :  { %v1028_v51 = vmul.f32 %v1027_v44, %v991_v25  ;;  %v1012_v14 = vsel %vm1009_vm12, %v1011_v9, %v1007_v1  ;;  %v2627_v25 = vld [vmem:[%s2780_s19 + $0x8] ss:$0 sm:$0xff]  ;;  %v1540_v1 = vld [vmem:[%s2779_s18 + $0x100] sm:$0xff]  ;;  %v1535_v9 = vld [vmem:[%s2779_s18 + $0xd8] sm:$0xff] }
0x1043   :  { %v1013_v54 = vmul.f32 %v1012_v14, %v990_v41  ;;  %v1539_v41 = vld [vmem:[%s2779_s18 + $0xf8] sm:$0xff]  ;;  %v1537_v14 = vld [vmem:[%s2779_s18 + $0xe8] sm:$0xff] }
0x1044   :  { %v1332_v53 = vrot.slane %v1028_v51, 7  ;;  %v1543_v51 = vld [vmem:[%s2779_s18 + $0x118] sm:$0xff]  ;;  %1581 = vmatpush.msra.mxu3 %v1539_v41 }
0x1045   :  { %1600 = vmatpush.msra.mxu0 %v1543_v51 }
0x1046   :  { %v1333_v34 = vsel %vm336_vm13, %v1332_v53, %v1013_v54  ;;  %v1536_v53 = vld [vmem:[%s2779_s18 + $0xe0] sm:$0xff] }
0x1047   :  { %1601 = vmatpush.msra.mxu0 %v1540_v1  ;;  %v1532_v54 = vld [vmem:[%s2779_s18 + $0xc0] sm:$0xff]  ;;  %1582 = vmatpush.msra.mxu3 %v1536_v53 }
0x1049   :  { %1602 = vmatpush.msra.mxu0 %v1537_v14 }
0x1059   :  { %v1340_v49 = vpop.permute.xlu2 %1339 }
0x105a   :  { %v1352_v47 = vsel %vm105_vm0, %v1333_v34, %v1340_v49  ;;  %v1533_v49 = vld [vmem:[%s2779_s18 + $0xc8] sm:$0xff] }
0x105b   :  { %1583 = vmatpush.msra.mxu3 %v1533_v49 }
0x107e   :  { %v1418_v57 = vpop.f32.mrf.mxu0 }
0x107f   :  { %v1419_v42 = vadd.f32 %v1711_v40, %v1418_v57  ;;  %v1527_v40 = vld [vmem:[%s2779_s18 + $0x98] sm:$0xff] }
0x1081   :  { %1442 = vrot.lane.b32.xlu2 %v1419_v42, %s1832_s28 }
0x1089   :  { %1458 = vrot.lane.b32.xlu2 %v2553_v27, %s2795_s26 }
0x10ac   :  { %v1694_v46 = vpop.permute.xlu1 %1693 }
0x10ad   :  { %v1696_v35 = vunpack.i.h.bf16 %v1694_v46  ;;  %v1695_v55 = vunpack.i.l.bf16 %v1694_v46  ;;  %v1534_v46 = vld [vmem:[%s2779_s18 + $0xd0] sm:$0xff] }
0x10ae   :  { %1603 = vmatpush.msra.mxu0 %v1534_v46 }
0x10af   :  { %v1353_v36 = vsel %vm107_vm2, %v1352_v47, %v1695_v55  ;;  %v1530_v55 = vld [vmem:[%s2779_s18 + $0xb0] sm:$0xff] }
0x10b0   :  { %v1354_v39 = vsel %vm109_vm3, %v1353_v36, %v1696_v35  ;;  %v1529_v35 = vld [vmem:[%s2779_s18 + $0xa8] sm:$0xff]  ;;  %v1531_v36 = vld [vmem:[%s2779_s18 + $0xb8] sm:$0xff]  ;;  %1584 = vmatpush.msra.mxu3 %v1530_v55 }
0x10b1   :  { %1389 = vmatmul.f32.vlgmr.msrb.gmra.mxu1 %v1354_v39  ;;  %v1526_v39 = vld [vmem:[%s2779_s18 + $0x90] sm:$0xff]  ;;  %1604 = vmatpush.msra.mxu0 %v1531_v36 }
0x10b2   :  { %1585 = vmatpush.msra.mxu3 %v1527_v40 }
0x10db   :  { %v1443_v61 = vpop.permute.xlu2 %1442 }
0x10e3   :  { %v1459_v12 = vpop.permute.xlu2 %1458 }
0x112e   :  { %v1390_v52 = vpop.f32.mrf.mxu1 }
0x112f   :  { %v1391_v58 = vadd.f32 %v1712_v48, %v1390_v52  ;;  %v1523_v48 = vld [vmem:[%s2779_s18 + $0x78] sm:$0xff]  ;;  %v1524_v52 = vld [vmem:[%s2779_s18 + $0x80] sm:$0xff] }
0x1130   :  { %1586 = vmatpush.msra.mxu3 %v1524_v52 }
0x1131   :  { %v1421_v7 = vadd.f32 %v1419_v42, %v1391_v58  ;;  %v1528_v42 = vld [vmem:[%s2779_s18 + $0xa0] sm:$0xff] }
0x1132   :  { %1605 = vmatpush.msra.mxu0 %v1528_v42 }
0x1133   :  { %v1658_v29 = vmul.f32 -1.442695, %v1421_v7  ;;  %v1525_v7 = vld [vmem:[%s2779_s18 + $0x88] sm:$0xff] }
0x1134   :  { %1606 = vmatpush.msra.mxu0 %v1525_v7 }
0x1135   :  { %1804 = vpow2.f32 %v1658_v29  ;;  %v1520_v29 = vld [vmem:[%s2779_s18 + $0x60] sm:$0xff] }
0x113b   :  { %v1805_v56 = vpop.eup %1804 }
0x113c   :  { %v1425_v4 = vadd.f32 1.0, %v1805_v56  ;;  %v1521_v56 = vld [vmem:[%s2779_s18 + $0x68] sm:$0xff] }
0x113d   :  { %1587 = vmatpush.msra.mxu3 %v1521_v56 }
0x113e   :  { %1806 = vrcp.f32 %v1425_v4  ;;  %v1437_v2 = vand.u32 2147483648, %v1425_v4  ;;  %v1435_v3 = vand.u32 2147483647, %v1425_v4  ;;  %vm1431_vm14 = vweird.f32 %v1425_v4 }
0x1140   :  { %v1438_v6 = vor.u32 1.1754944e-38, %v1437_v2  ;;  %vm1436_vm4 = vcmp.eq.f32.partialorder %v1435_v3, 8.507059e+37  ;;  %v1514_v3 = vld [vmem:[%s2779_s18 + $0x30] sm:$0xff] }
0x1144   :  { %v1807_v38 = vpop.eup %1806 }
0x1145   :  { %v1427_v32 = vmul.f32 %v1807_v38, %v1425_v4  ;;  %vm1432_vm13 = vweird.f32 %v1807_v38 }
0x1146   :  { %vm1433_vm15 = vmor %vm1431_vm14, %vm1432_vm13 }
0x1147   :  { %v1428_v0 = vsub.f32 1.0, %v1427_v32  ;;  %v1517_v32 = vld [vmem:[%s2779_s18 + $0x48] sm:$0xff] }
0x1149   :  { %v1429_v28 = vmul.f32 %v1807_v38, %v1428_v0  ;;  %v1518_v0 = vld [vmem:[%s2779_s18 + $0x50] sm:$0xff] }
0x114a   :  { %1588 = vmatpush.msra.mxu3 %v1518_v0 }
0x114b   :  { %v1430_v27 = vadd.f32 %v1807_v38, %v1429_v28  ;;  %v1519_v28 = vld [vmem:[%s2779_s18 + $0x58] sm:$0xff] }
0x114d   :  { %v1434_v30 = vsel %vm1433_vm15, %v1807_v38, %v1430_v27  ;;  %v1522_v38 = vld [vmem:[%s2779_s18 + $0x70] sm:$0xff]  ;;  %v1515_v27 = vld [vmem:[%s2779_s18 + $0x38] sm:$0xff] }
0x114e   :  { %v1439_v8 = vsel %vm1436_vm4, %v1438_v6, %v1434_v30  ;;  %1607 = vmatpush.msra.mxu0 %v1522_v38  ;;  %1589 = vmatpush.msra.mxu3 %v1515_v27 }
0x114f   :  { %v1445_v63 = vmul.f32 %v1443_v61, %v1439_v8  ;;  %v1452_v16 = vsub.f32 1.0, %v1439_v8  ;;  %v1461_v20 = vmul.f32 %v1459_v12, %v1439_v8  ;;  %v1516_v8 = vld [vmem:[%s2779_s18 + $0x40] sm:$0xff] }
0x1150   :  { %1608 = vmatpush.msra.mxu0 %v1519_v28 }
0x1151   :  { %1447 = vrot.lane.b32.xlu1 %v1445_v63, %s1832_s28  ;;  %v1511_v63 = vld [vmem:[%s2779_s18 + $0x18] sm:$0xff] }
0x1152   :  { %1609 = vmatpush.msra.mxu0 %v1516_v8 }
0x11c3   :  { %v1448_v62 = vpop.permute.xlu1 %1447 }
0x11c4   :  { %v1450_v60 = vadd.f32 %v1448_v62, %v1391_v58  ;;  %v1512_v62 = vld [vmem:[%s2779_s18 + $0x20] sm:$0xff] }
0x11c5   :  { %1590 = vmatpush.msra.mxu3 %v1512_v62 }
0x11c6   :  { %1808 = vtanh.f32 %v1450_v60  ;;  %v1513_v60 = vld [vmem:[%s2779_s18 + $0x28] sm:$0xff] }
0x11c7   :  { %1610 = vmatpush.msra.mxu0 %v1513_v60 }
0x11cc   :  { %v1809_v11 = vpop.eup %1808 }
0x11cd   :  { %1454 = vrot.lane.b32.xlu0 %v1809_v11, %s1831_s1 }
0x123f   :  { %v1455_v17 = vpop.permute.xlu0 %1454 }
0x1240   :  { %v1457_v21 = vmul.f32 %v1455_v17, %v1452_v16  ;;  %v1508_v16 = vld [vmem:[%s2779_s18] sm:$0xff]  ;;  %v1509_v17 = vld [vmem:[%s2779_s18 + $0x8] sm:$0xff] }
0x1241   :  { %1591 = vmatpush.msra.mxu3 %v1509_v17 }
0x1242   :  { %v1462_v13 = vadd.f32 %v1461_v20, %v1457_v21  ;;  %v1510_v20 = vld [vmem:[%s2779_s18 + $0x10] sm:$0xff] }
0x1243   :  { %1611 = vmatpush.msra.mxu0 %v1510_v20 }
0x1244   :  { %1465 = vrot.lane.b32.xlu1 %v1462_v13, %s1831_s1 }
0x12b6   :  { %v1466_v15 = vpop.permute.xlu1 %1465 }
0x12b7   :  { %v1468_v18 = vsel %vm226_vm8, %v1466_v15, 0.0  ;;  %v1659_v15 = vld [vmem:[%s2779_s18 + $0x120] ss:$8 sm:$0x7] }
0x12b8   :  { %1469 = vadd.xlane.f32.xlu0 %v1468_v18  ;;  %v1549_v18 = vperm.slane %v1659_v15, 2 }
0x132b   :  { %v1470_v19 = vpop.xlane.xlu0 %1469 }
0x132c   :  { %v1471_v22 = vmul.f32 %v1470_v19, %v2041_v10 }
0x132e   :  { %v2619_v23 = vsub.f32 %v1462_v13, %v1471_v22 }
0x1330   :  { %v1473_v24 = vmul.f32 %v2619_v23, %v2619_v23 }
0x1332   :  { %1475 = vrot.lane.b32.xlu2 %v1473_v24, %s1831_s1  ;;  %v1548_v24 = vperm.slane %v1659_v15, 1 }
0x133a   :  { %1496 = vrot.lane.b32.xlu2 %v2627_v25, %s2795_s26 }
0x138c   :  { %v1476_v31 = vpop.permute.xlu2 %1475 }
0x138d   :  { %v1478_v33 = vsel %vm226_vm8, %v1476_v31, 0.0 }
0x138e   :  { %1479 = vadd.xlane.f32.xlu1 %v1478_v33 }
0x1394   :  { %v1497_v30 = vpop.permute.xlu2 %1496 }
0x1401   :  { %v1480_v43 = vpop.xlane.xlu1 %1479 }
0x1402   :  { %v1481_v59 = vmul.f32 %v1480_v43, %v2041_v10  ;;  %v1538_v10 = vld [vmem:[%s2779_s18 + $0xf0] sm:$0xff] }
0x1403   :  { %1561 = vmatpush.msrb.mxu2 %v1538_v10 }
0x1404   :  { %v1482_v44 = vadd.f32 1e-05, %v1481_v59 }
0x1405   :  { %1562 = vmatpush.msrb.mxu2 %v1535_v9 }
0x1406   :  { %1810 = vrsqrt.f32 %v1482_v44  ;;  %vm1489_vm1 = vweird.f32 %v1482_v44 }
0x1407   :  { %1563 = vmatpush.msrb.mxu2 %v1532_v54 }
0x1409   :  { %1564 = vmatpush.msrb.mxu2 %v1529_v35 }
0x140b   :  { %1565 = vmatpush.msrb.mxu2 %v1526_v39 }
0x140c   :  { %v1811_v34 = vpop.eup %1810 }
0x140d   :  { %v1484_v47 = vmul.f32 %v1811_v34, %v1482_v44  ;;  %vm1490_vm8 = vweird.f32 %v1811_v34  ;;  %1566 = vmatpush.msrb.mxu2 %v1523_v48 }
0x140e   :  { %vm1491_vm5 = vmor %vm1489_vm1, %vm1490_vm8 }
0x140f   :  { %v1485_v57 = vmul.f32 %v1811_v34, %v1484_v47  ;;  %1567 = vmatpush.msrb.mxu2 %v1520_v29 }
0x1411   :  { %v1486_v58 = vmul.f32 0.5, %v1485_v57  ;;  %1568 = vmatpush.msrb.mxu2 %v1517_v32 }
0x1413   :  { %v1487_v4 = vsub.f32 1.5, %v1486_v58  ;;  %1569 = vmatpush.msrb.mxu2 %v1514_v3 }
0x1415   :  { %v1488_v2 = vmul.f32 %v1811_v34, %v1487_v4  ;;  %1570 = vmatpush.msrb.mxu2 %v1511_v63 }
0x1417   :  { %v1492_v6 = vsel %vm1491_vm5, %v1811_v34, %v1488_v2  ;;  %1571 = vmatpush.msrb.mxu2 %v1508_v16 }
0x1418   :  { %v1493_v61 = vmul.f32 %v1492_v6, %v2619_v23 }
0x141a   :  { %v1499_v11 = vmul.f32 %v1497_v30, %v1493_v61 }
0x141c   :  { %v1500_v12 = vadd.f32 %v2627_v25, %v1499_v11  ;;  %v1547_v25 = vperm.slane %v1659_v15, 0 }
0x141e   :  { %1503 = vrot.lane.b32.xlu2 %v1500_v12, %s2795_s26 }
0x1426   :  { %1616 = vrot.lane.b32.xlu2 %v2272_v5, %s1831_s1  ;;  %v1506_v5 = vsel %vm105_vm0, %v2071_v37, %v2347_v26  ;;  %vm1630_vm0 = vcmask 1045508  }
0x1478   :  { %v1504_v21 = vpop.permute.xlu2 %1503 }
0x1479   :  { %v1507_v13 = vsel %vm107_vm2, %v1506_v5, %v1504_v21  ;;  %vm1628_vm2 = vcmask 1041408  }
0x147a   :  { %1660 = vmatmul.msk.f32.vlgmr.msrb.gmra.mxu2 %vm109_vm3, %v1507_v13  ;;  %1661 = vmatmul.msk.f32.vlgmr.msra.gmra.mxu3 %vm109_vm3, %v1507_v13 }
0x147b   :  { %1662 = vmatmul.msk.f32.vlgmr.msra.gmra.mxu0 %vm109_vm3, %v1507_v13 }
0x1480   :  { %v1617_v22 = vpop.permute.xlu2 %1616 }
0x1481   :  { %v1619_v37 = vsel %vm109_vm3, %v1507_v13, %v1617_v22 }
0x1482   :  { %v1627_v59 = vrot.slane %v1619_v37, 2 }
0x14f8   :  { %v1613_v19 = vpop.f32.mrf.mxu0 }
0x14f9   :  { %v1614_v23 = vadd.f32 %v1613_v19, %v1549_v18 }
0x14fb   :  { %v1626_v33 = vrot.slane %v1614_v23, 4 }
0x14fd   :  { %v1573_v26 = vpop.f32.mrf.mxu2  ;;  %v1593_v31 = vpop.f32.mrf.mxu3  ;;  %v1631_v50 = vsel %vm1630_vm0, %v1626_v33, %v1627_v59 }
0x14fe   :  { %v1594_v43 = vadd.f32 %v1593_v31, %v1548_v24  ;;  %v1574_v44 = vadd.f32 %v1573_v26, %v1547_v25 }
0x1500   :  { %v1625_v45 = vrot.slane %v1594_v43, 6 }
0x1502   :  { %v1629_v51 = vsel %vm1628_vm2, %v1574_v44, %v1625_v45 }
0x1503   :  { %v1632_v10 = vsel %vm734_vm7, %v1629_v51, %v1631_v50 }
0x1504   :  { %1634 = vst [vmem:[%s2781_s20] sm:$0xff] %v1632_v10 }
0x1505   :  { %1640 = vsyncpa [#allocation3], 1 }

</bundles_post_ra>
